<compile_context>
chip_gen: v6e
topology: v6e:2x2x1
jax: 0.10.0
libtpu: 0.0.40
codegen_flags: <defaults>
</compile_context>

<pallas_src>
import functools

import jax
import jax.numpy as jnp
from jax.experimental import pallas as pl
from jax.experimental.pallas import tpu as pltpu


def _round_up(x, m):
    return (x + m - 1) // m * m


def _re_head_kernel(seq_len, batch, flag_ref, hid_hbm, w_ref, b_ref, out_ref,
                    starts, ends, sems):
    """flag_ref : SMEM (B, 2) int32   scalar-prefetched gather indices
       hid_hbm  : HBM  (B*S, H)       last_hidden_state (flattened), never copied wholesale
       w_ref    : VMEM (2, H, Lp)     classifier weight (w[0] subject half, w[1] object half)
       b_ref    : VMEM (1, Lp)        classifier bias (zero-padded to Lp lanes)
       out_ref  : VMEM (TB, Lp)       logits block for this batch tile
       starts   : VMEM (TB, H)        scratch: gathered subject-start rows
       ends     : VMEM (TB, H)        scratch: gathered object-start rows
       sems     : DMA semaphores (TB, 2)
    """
    tile = pl.program_id(0)
    TB, _ = starts.shape

    # Issue all 2*TB single-row gathers (HBM -> VMEM scratch) up front so the
    # DMAs overlap each other; padded tile rows are clamped to a valid example
    # (their logits are sliced away in the wrapper).  All SMEM scalar reads
    # happen before any DMA wait.
    sub_copies = []
    obj_copies = []
    for r in range(TB):                       # TB is small & static -> unrolled
        ex = jnp.minimum(tile * TB + r, batch - 1)
        sub_idx = flag_ref[ex, 0]
        obj_idx = flag_ref[ex, 1]
        c_sub = pltpu.make_async_copy(
            hid_hbm.at[pl.ds(ex * seq_len + sub_idx, 1), :],
            starts.at[pl.ds(r, 1), :],
            sems.at[r, 0])
        c_obj = pltpu.make_async_copy(
            hid_hbm.at[pl.ds(ex * seq_len + obj_idx, 1), :],
            ends.at[pl.ds(r, 1), :],
            sems.at[r, 1])
        c_sub.start()
        c_obj.start()
        sub_copies.append(c_sub)
        obj_copies.append(c_obj)

    # concat([start, end]) @ W + b  ==  start @ W[:H] + end @ W[H:] + b
    # Wait only on the subject rows first so the first MXU pass overlaps the
    # remaining object-row DMAs.  Lp is a multiple of 128 -> unmasked stores.
    for c in sub_copies:
        c.wait()
    acc = jnp.dot(starts[...], w_ref[0], preferred_element_type=jnp.float32)
    acc = acc + b_ref[...]

    for c in obj_copies:
        c.wait()
    acc = acc + jnp.dot(ends[...], w_ref[1], preferred_element_type=jnp.float32)

    out_ref[...] = acc.astype(out_ref.dtype)


def re_model_head(last_hidden_state, flag, w, b, *, tile_b=8):
    """Pallas call for the REModel head.

    last_hidden_state: f32[B, S, H]
    flag             : i32[B, 2]   (sub_start_idx, obj_start_idx) per example
    w                : f32[2H, L]  (= torch linear.weight.T)
    b                : f32[1, L]
    returns logits   : f32[B, L]
    """
    B, S, H = last_hidden_state.shape
    L = w.shape[1]
    assert w.shape[0] == 2 * H

    Lp = _round_up(max(L, 128), 128)            # lane-dense output / full MXU N pass
    Bp = _round_up(max(B, tile_b), tile_b)      # sublane-friendly M, whole batch tiles
    n_tiles = Bp // tile_b

    # Repack classifier weight as (2, H, Lp): leading-axis indexing in-kernel is a
    # free view (no mid-sublane slicing).  Padding is zero so logits[:, :L] match.
    w3 = jnp.zeros((2, H, Lp), dtype=w.dtype)
    w3 = w3.at[0, :, :L].set(w[:H, :])
    w3 = w3.at[1, :, :L].set(w[H:, :])
    bp = jnp.zeros((1, Lp), dtype=b.dtype).at[:, :L].set(b.reshape(1, L))

    # Safety: VMEM/DMA gathers have no useful runtime bounds check -> clamp indices.
    flag = jnp.clip(flag.astype(jnp.int32), 0, S - 1)

    # Flatten (B, S, H) -> (B*S, H): contiguous, metadata-only, stays in HBM.
    hid2d = last_hidden_state.reshape(B * S, H)

    kernel = functools.partial(_re_head_kernel, S, B)

    # TODO(synk): for production (v6e/v7x) feed the encoder output / weights in
    # bfloat16 to halve gather+weight DMA bytes (accumulation stays f32 here).
    out = pl.pallas_call(
        kernel,
        out_shape=jax.ShapeDtypeStruct((Bp, Lp), jnp.float32),
        grid_spec=pltpu.PrefetchScalarGridSpec(
            num_scalar_prefetch=1,               # `flag` -> SMEM
            grid=(n_tiles,),
            in_specs=[
                pl.BlockSpec(memory_space=pl.ANY),                    # hidden stays in HBM
                pl.BlockSpec((2, H, Lp), lambda i, flag: (0, 0, 0)),  # weight (resident)
                pl.BlockSpec((1, Lp), lambda i, flag: (0, 0)),        # bias   (resident)
            ],
            out_specs=pl.BlockSpec((tile_b, Lp), lambda i, flag: (i, 0)),
            scratch_shapes=[
                pltpu.VMEM((tile_b, H), last_hidden_state.dtype),     # gathered starts
                pltpu.VMEM((tile_b, H), last_hidden_state.dtype),     # gathered ends
                pltpu.SemaphoreType.DMA((tile_b, 2)),
            ],
        ),
        compiler_params=pltpu.CompilerParams(
            dimension_semantics=("parallel",)),   # batch tiles shard across TCs (v7x)
    )(flag, hid2d, w3, bp)

    return out[:B, :L]


def stub_encoder(input_ids, token_type_ids, attention_mask, word_emb, type_emb):
    # TODO(synk): the real encoder is a pretrained BERT/ZEN transformer injected via
    # `encoder_class.from_pretrained(...)`; replaced by a deterministic embedding-sum
    # stub producing last_hidden_state [B, S, H].
    h = word_emb[input_ids] + type_emb[token_type_ids]
    return h * attention_mask[..., None].astype(h.dtype)


if __name__ == "__main__":
    # Small, forward-consistent shapes.
    B, S, H, L = 2, 8, 32, 5          # batch, seq_len, hidden_size, num_labels
    VOCAB, NTYPES = 50, 2

    key = jax.random.PRNGKey(0)
    k_ids, k_flag, k_wemb, k_temb, k_w, k_b = jax.random.split(key, 6)

    input_ids = jax.random.randint(k_ids, (B, S), 0, VOCAB, dtype=jnp.int32)
    token_type_ids = jnp.zeros((B, S), dtype=jnp.int32)
    attention_mask = jnp.ones((B, S), dtype=jnp.int32)
    flag = jax.random.randint(k_flag, (B, 2), 0, S, dtype=jnp.int32)

    # Deterministic synthetic parameters (not a checkpoint load).
    word_emb = jax.random.normal(k_wemb, (VOCAB, H), dtype=jnp.float32) * 0.1
    type_emb = jax.random.normal(k_temb, (NTYPES, H), dtype=jnp.float32) * 0.1
    w = jax.random.normal(k_w, (2 * H, L), dtype=jnp.float32) * 0.05   # = linear.weight.T
    b = jax.random.normal(k_b, (1, L), dtype=jnp.float32) * 0.05

    # Encoder (plain-JAX stub) -> last_hidden_state [B, S, H].
    last_hidden_state = stub_encoder(input_ids, token_type_ids, attention_mask,
                                     word_emb, type_emb)

    # Pallas kernel: entity gather + classifier.
    logits = re_model_head(last_hidden_state, flag, w, b)
    logits = jax.block_until_ready(logits)

    # Pure-JAX reference of the same head (gather -> concat -> linear).
    start_ref = last_hidden_state[jnp.arange(B), flag[:, 0]]
    end_ref = last_hidden_state[jnp.arange(B), flag[:, 1]]
    entity_hidden_state = jnp.concatenate([start_ref, end_ref], axis=-1)
    ref_logits = entity_hidden_state @ w + b[0]

    assert logits.shape == (B, L)
    assert jnp.allclose(logits, ref_logits, atol=1e-5, rtol=1e-5), (
        f"mismatch:\n{logits}\nvs\n{ref_logits}")

    print("KERNEL_OK")
</pallas_src>

<mosaic_0001>
module attributes {stable_mosaic.version = 11 : i64} {
  func.func @_re_head_kernel(%arg0: i32, %arg1: memref<2x2xi32, #tpu.memory_space<smem>>, %arg2: memref<16x32xf32, #tpu.memory_space<any>>, %arg3: memref<2x32x128xf32, #tpu.memory_space<vmem>>, %arg4: memref<1x128xf32, #tpu.memory_space<vmem>>, %arg5: memref<8x128xf32, #tpu.memory_space<vmem>>, %arg6: memref<8x32xf32, #tpu.memory_space<vmem>>, %arg7: memref<8x32xf32, #tpu.memory_space<vmem>>, %arg8: memref<8x2x!tpu.dma_semaphore, #tpu.memory_space<semaphore_mem>>) attributes {dimension_semantics = [#tpu.dimension_semantics<parallel>], iteration_bounds = array<i64: 1>, scalar_prefetch = 1 : i64, scratch_operands = 3 : i64, tpu.core_type = #tpu.core_type<tc>, window_params = [{}, {pipeline_mode = #tpu.pipeline_mode<synchronous>, transform_indices = @transform_1, window_bounds = array<i64: 2, 32, 128>}, {pipeline_mode = #tpu.pipeline_mode<synchronous>, transform_indices = @transform_2, window_bounds = array<i64: 1, 128>}, {transform_indices = @transform_3, window_bounds = array<i64: 8, 128>}]} {
    %c8_i32 = arith.constant 8 : i32
    %0 = arith.muli %arg0, %c8_i32 : i32
    %c0_i32 = arith.constant 0 : i32
    %1 = arith.addi %0, %c0_i32 : i32
    %c1_i32 = arith.constant 1 : i32
    %2 = arith.minsi %1, %c1_i32 : i32
    %3 = arith.index_cast %2 : i32 to index
    %c0 = arith.constant 0 : index
    %4 = memref.load %arg1[%3, %c0] : memref<2x2xi32, #tpu.memory_space<smem>>
    %5 = arith.index_cast %2 : i32 to index
    %c1 = arith.constant 1 : index
    %6 = memref.load %arg1[%5, %c1] : memref<2x2xi32, #tpu.memory_space<smem>>
    %c8_i32_0 = arith.constant 8 : i32
    %7 = arith.muli %2, %c8_i32_0 : i32
    %8 = arith.addi %7, %4 : i32
    %c8_i32_1 = arith.constant 8 : i32
    %9 = arith.muli %2, %c8_i32_1 : i32
    %10 = arith.addi %9, %6 : i32
    %c0_i32_2 = arith.constant 0 : i32
    %c0_i32_3 = arith.constant 0 : i32
    %c0_i32_4 = arith.constant 0 : i32
    %11 = tpu.memref_slice %arg2[%8, %c0_i32_4] : memref<16x32xf32, #tpu.memory_space<any>> -> memref<1x32xf32, #tpu.memory_space<any>>
    %c0_i32_5 = arith.constant 0 : i32
    %c0_i32_6 = arith.constant 0 : i32
    %12 = tpu.memref_slice %arg6[%c0_i32_5, %c0_i32_6] : memref<8x32xf32, #tpu.memory_space<vmem>> -> memref<1x32xf32, #tpu.memory_space<vmem>>
    %13 = tpu.memref_slice %arg8[%c0_i32_2, %c0_i32_3] : memref<8x2x!tpu.dma_semaphore, #tpu.memory_space<semaphore_mem>> -> memref<1x1x!tpu.dma_semaphore, #tpu.memory_space<semaphore_mem>>
    %14 = tpu.memref_squeeze %13 : memref<1x1x!tpu.dma_semaphore, #tpu.memory_space<semaphore_mem>> -> memref<!tpu.dma_semaphore, #tpu.memory_space<semaphore_mem>>
    tpu.enqueue_dma source(%11 : memref<1x32xf32, #tpu.memory_space<any>>) target(%12 : memref<1x32xf32, #tpu.memory_space<vmem>>) target_semaphore(%14 : memref<!tpu.dma_semaphore, #tpu.memory_space<semaphore_mem>>)
    %c0_i32_7 = arith.constant 0 : i32
    %c1_i32_8 = arith.constant 1 : i32
    %c0_i32_9 = arith.constant 0 : i32
    %15 = tpu.memref_slice %arg2[%10, %c0_i32_9] : memref<16x32xf32, #tpu.memory_space<any>> -> memref<1x32xf32, #tpu.memory_space<any>>
    %c0_i32_10 = arith.constant 0 : i32
    %c0_i32_11 = arith.constant 0 : i32
    %16 = tpu.memref_slice %arg7[%c0_i32_10, %c0_i32_11] : memref<8x32xf32, #tpu.memory_space<vmem>> -> memref<1x32xf32, #tpu.memory_space<vmem>>
    %17 = tpu.memref_slice %arg8[%c0_i32_7, %c1_i32_8] : memref<8x2x!tpu.dma_semaphore, #tpu.memory_space<semaphore_mem>> -> memref<1x1x!tpu.dma_semaphore, #tpu.memory_space<semaphore_mem>>
    %18 = tpu.memref_squeeze %17 : memref<1x1x!tpu.dma_semaphore, #tpu.memory_space<semaphore_mem>> -> memref<!tpu.dma_semaphore, #tpu.memory_space<semaphore_mem>>
    tpu.enqueue_dma source(%15 : memref<1x32xf32, #tpu.memory_space<any>>) target(%16 : memref<1x32xf32, #tpu.memory_space<vmem>>) target_semaphore(%18 : memref<!tpu.dma_semaphore, #tpu.memory_space<semaphore_mem>>)
    %c8_i32_12 = arith.constant 8 : i32
    %19 = arith.muli %arg0, %c8_i32_12 : i32
    %c1_i32_13 = arith.constant 1 : i32
    %20 = arith.addi %19, %c1_i32_13 : i32
    %c1_i32_14 = arith.constant 1 : i32
    %21 = arith.minsi %20, %c1_i32_14 : i32
    %22 = arith.index_cast %21 : i32 to index
    %c0_15 = arith.constant 0 : index
    %23 = memref.load %arg1[%22, %c0_15] : memref<2x2xi32, #tpu.memory_space<smem>>
    %24 = arith.index_cast %21 : i32 to index
    %c1_16 = arith.constant 1 : index
    %25 = memref.load %arg1[%24, %c1_16] : memref<2x2xi32, #tpu.memory_space<smem>>
    %c8_i32_17 = arith.constant 8 : i32
    %26 = arith.muli %21, %c8_i32_17 : i32
    %27 = arith.addi %26, %23 : i32
    %c8_i32_18 = arith.constant 8 : i32
    %28 = arith.muli %21, %c8_i32_18 : i32
    %29 = arith.addi %28, %25 : i32
    %c1_i32_19 = arith.constant 1 : i32
    %c0_i32_20 = arith.constant 0 : i32
    %c0_i32_21 = arith.constant 0 : i32
    %30 = tpu.memref_slice %arg2[%27, %c0_i32_21] : memref<16x32xf32, #tpu.memory_space<any>> -> memref<1x32xf32, #tpu.memory_space<any>>
    %c1_i32_22 = arith.constant 1 : i32
    %c0_i32_23 = arith.constant 0 : i32
    %31 = tpu.memref_slice %arg6[%c1_i32_22, %c0_i32_23] : memref<8x32xf32, #tpu.memory_space<vmem>> -> memref<1x32xf32, #tpu.memory_space<vmem>>
    %32 = tpu.memref_slice %arg8[%c1_i32_19, %c0_i32_20] : memref<8x2x!tpu.dma_semaphore, #tpu.memory_space<semaphore_mem>> -> memref<1x1x!tpu.dma_semaphore, #tpu.memory_space<semaphore_mem>>
    %33 = tpu.memref_squeeze %32 : memref<1x1x!tpu.dma_semaphore, #tpu.memory_space<semaphore_mem>> -> memref<!tpu.dma_semaphore, #tpu.memory_space<semaphore_mem>>
    tpu.enqueue_dma source(%30 : memref<1x32xf32, #tpu.memory_space<any>>) target(%31 : memref<1x32xf32, #tpu.memory_space<vmem>>) target_semaphore(%33 : memref<!tpu.dma_semaphore, #tpu.memory_space<semaphore_mem>>)
    %c1_i32_24 = arith.constant 1 : i32
    %c1_i32_25 = arith.constant 1 : i32
    %c0_i32_26 = arith.constant 0 : i32
    %34 = tpu.memref_slice %arg2[%29, %c0_i32_26] : memref<16x32xf32, #tpu.memory_space<any>> -> memref<1x32xf32, #tpu.memory_space<any>>
    %c1_i32_27 = arith.constant 1 : i32
    %c0_i32_28 = arith.constant 0 : i32
    %35 = tpu.memref_slice %arg7[%c1_i32_27, %c0_i32_28] : memref<8x32xf32, #tpu.memory_space<vmem>> -> memref<1x32xf32, #tpu.memory_space<vmem>>
    %36 = tpu.memref_slice %arg8[%c1_i32_24, %c1_i32_25] : memref<8x2x!tpu.dma_semaphore, #tpu.memory_space<semaphore_mem>> -> memref<1x1x!tpu.dma_semaphore, #tpu.memory_space<semaphore_mem>>
    %37 = tpu.memref_squeeze %36 : memref<1x1x!tpu.dma_semaphore, #tpu.memory_space<semaphore_mem>> -> memref<!tpu.dma_semaphore, #tpu.memory_space<semaphore_mem>>
    tpu.enqueue_dma source(%34 : memref<1x32xf32, #tpu.memory_space<any>>) target(%35 : memref<1x32xf32, #tpu.memory_space<vmem>>) target_semaphore(%37 : memref<!tpu.dma_semaphore, #tpu.memory_space<semaphore_mem>>)
    %c8_i32_29 = arith.constant 8 : i32
    %38 = arith.muli %arg0, %c8_i32_29 : i32
    %c2_i32 = arith.constant 2 : i32
    %39 = arith.addi %38, %c2_i32 : i32
    %c1_i32_30 = arith.constant 1 : i32
    %40 = arith.minsi %39, %c1_i32_30 : i32
    %41 = arith.index_cast %40 : i32 to index
    %c0_31 = arith.constant 0 : index
    %42 = memref.load %arg1[%41, %c0_31] : memref<2x2xi32, #tpu.memory_space<smem>>
    %43 = arith.index_cast %40 : i32 to index
    %c1_32 = arith.constant 1 : index
    %44 = memref.load %arg1[%43, %c1_32] : memref<2x2xi32, #tpu.memory_space<smem>>
    %c8_i32_33 = arith.constant 8 : i32
    %45 = arith.muli %40, %c8_i32_33 : i32
    %46 = arith.addi %45, %42 : i32
    %c8_i32_34 = arith.constant 8 : i32
    %47 = arith.muli %40, %c8_i32_34 : i32
    %48 = arith.addi %47, %44 : i32
    %c2_i32_35 = arith.constant 2 : i32
    %c0_i32_36 = arith.constant 0 : i32
    %c0_i32_37 = arith.constant 0 : i32
    %49 = tpu.memref_slice %arg2[%46, %c0_i32_37] : memref<16x32xf32, #tpu.memory_space<any>> -> memref<1x32xf32, #tpu.memory_space<any>>
    %c2_i32_38 = arith.constant 2 : i32
    %c0_i32_39 = arith.constant 0 : i32
    %50 = tpu.memref_slice %arg6[%c2_i32_38, %c0_i32_39] : memref<8x32xf32, #tpu.memory_space<vmem>> -> memref<1x32xf32, #tpu.memory_space<vmem>>
    %51 = tpu.memref_slice %arg8[%c2_i32_35, %c0_i32_36] : memref<8x2x!tpu.dma_semaphore, #tpu.memory_space<semaphore_mem>> -> memref<1x1x!tpu.dma_semaphore, #tpu.memory_space<semaphore_mem>>
    %52 = tpu.memref_squeeze %51 : memref<1x1x!tpu.dma_semaphore, #tpu.memory_space<semaphore_mem>> -> memref<!tpu.dma_semaphore, #tpu.memory_space<semaphore_mem>>
    tpu.enqueue_dma source(%49 : memref<1x32xf32, #tpu.memory_space<any>>) target(%50 : memref<1x32xf32, #tpu.memory_space<vmem>>) target_semaphore(%52 : memref<!tpu.dma_semaphore, #tpu.memory_space<semaphore_mem>>)
    %c2_i32_40 = arith.constant 2 : i32
    %c1_i32_41 = arith.constant 1 : i32
    %c0_i32_42 = arith.constant 0 : i32
    %53 = tpu.memref_slice %arg2[%48, %c0_i32_42] : memref<16x32xf32, #tpu.memory_space<any>> -> memref<1x32xf32, #tpu.memory_space<any>>
    %c2_i32_43 = arith.constant 2 : i32
    %c0_i32_44 = arith.constant 0 : i32
    %54 = tpu.memref_slice %arg7[%c2_i32_43, %c0_i32_44] : memref<8x32xf32, #tpu.memory_space<vmem>> -> memref<1x32xf32, #tpu.memory_space<vmem>>
    %55 = tpu.memref_slice %arg8[%c2_i32_40, %c1_i32_41] : memref<8x2x!tpu.dma_semaphore, #tpu.memory_space<semaphore_mem>> -> memref<1x1x!tpu.dma_semaphore, #tpu.memory_space<semaphore_mem>>
    %56 = tpu.memref_squeeze %55 : memref<1x1x!tpu.dma_semaphore, #tpu.memory_space<semaphore_mem>> -> memref<!tpu.dma_semaphore, #tpu.memory_space<semaphore_mem>>
    tpu.enqueue_dma source(%53 : memref<1x32xf32, #tpu.memory_space<any>>) target(%54 : memref<1x32xf32, #tpu.memory_space<vmem>>) target_semaphore(%56 : memref<!tpu.dma_semaphore, #tpu.memory_space<semaphore_mem>>)
    %c8_i32_45 = arith.constant 8 : i32
    %57 = arith.muli %arg0, %c8_i32_45 : i32
    %c3_i32 = arith.constant 3 : i32
    %58 = arith.addi %57, %c3_i32 : i32
    %c1_i32_46 = arith.constant 1 : i32
    %59 = arith.minsi %58, %c1_i32_46 : i32
    %60 = arith.index_cast %59 : i32 to index
    %c0_47 = arith.constant 0 : index
    %61 = memref.load %arg1[%60, %c0_47] : memref<2x2xi32, #tpu.memory_space<smem>>
    %62 = arith.index_cast %59 : i32 to index
    %c1_48 = arith.constant 1 : index
    %63 = memref.load %arg1[%62, %c1_48] : memref<2x2xi32, #tpu.memory_space<smem>>
    %c8_i32_49 = arith.constant 8 : i32
    %64 = arith.muli %59, %c8_i32_49 : i32
    %65 = arith.addi %64, %61 : i32
    %c8_i32_50 = arith.constant 8 : i32
    %66 = arith.muli %59, %c8_i32_50 : i32
    %67 = arith.addi %66, %63 : i32
    %c3_i32_51 = arith.constant 3 : i32
    %c0_i32_52 = arith.constant 0 : i32
    %c0_i32_53 = arith.constant 0 : i32
    %68 = tpu.memref_slice %arg2[%65, %c0_i32_53] : memref<16x32xf32, #tpu.memory_space<any>> -> memref<1x32xf32, #tpu.memory_space<any>>
    %c3_i32_54 = arith.constant 3 : i32
    %c0_i32_55 = arith.constant 0 : i32
    %69 = tpu.memref_slice %arg6[%c3_i32_54, %c0_i32_55] : memref<8x32xf32, #tpu.memory_space<vmem>> -> memref<1x32xf32, #tpu.memory_space<vmem>>
    %70 = tpu.memref_slice %arg8[%c3_i32_51, %c0_i32_52] : memref<8x2x!tpu.dma_semaphore, #tpu.memory_space<semaphore_mem>> -> memref<1x1x!tpu.dma_semaphore, #tpu.memory_space<semaphore_mem>>
    %71 = tpu.memref_squeeze %70 : memref<1x1x!tpu.dma_semaphore, #tpu.memory_space<semaphore_mem>> -> memref<!tpu.dma_semaphore, #tpu.memory_space<semaphore_mem>>
    tpu.enqueue_dma source(%68 : memref<1x32xf32, #tpu.memory_space<any>>) target(%69 : memref<1x32xf32, #tpu.memory_space<vmem>>) target_semaphore(%71 : memref<!tpu.dma_semaphore, #tpu.memory_space<semaphore_mem>>)
    %c3_i32_56 = arith.constant 3 : i32
    %c1_i32_57 = arith.constant 1 : i32
    %c0_i32_58 = arith.constant 0 : i32
    %72 = tpu.memref_slice %arg2[%67, %c0_i32_58] : memref<16x32xf32, #tpu.memory_space<any>> -> memref<1x32xf32, #tpu.memory_space<any>>
    %c3_i32_59 = arith.constant 3 : i32
    %c0_i32_60 = arith.constant 0 : i32
    %73 = tpu.memref_slice %arg7[%c3_i32_59, %c0_i32_60] : memref<8x32xf32, #tpu.memory_space<vmem>> -> memref<1x32xf32, #tpu.memory_space<vmem>>
    %74 = tpu.memref_slice %arg8[%c3_i32_56, %c1_i32_57] : memref<8x2x!tpu.dma_semaphore, #tpu.memory_space<semaphore_mem>> -> memref<1x1x!tpu.dma_semaphore, #tpu.memory_space<semaphore_mem>>
    %75 = tpu.memref_squeeze %74 : memref<1x1x!tpu.dma_semaphore, #tpu.memory_space<semaphore_mem>> -> memref<!tpu.dma_semaphore, #tpu.memory_space<semaphore_mem>>
    tpu.enqueue_dma source(%72 : memref<1x32xf32, #tpu.memory_space<any>>) target(%73 : memref<1x32xf32, #tpu.memory_space<vmem>>) target_semaphore(%75 : memref<!tpu.dma_semaphore, #tpu.memory_space<semaphore_mem>>)
    %c8_i32_61 = arith.constant 8 : i32
    %76 = arith.muli %arg0, %c8_i32_61 : i32
    %c4_i32 = arith.constant 4 : i32
    %77 = arith.addi %76, %c4_i32 : i32
    %c1_i32_62 = arith.constant 1 : i32
    %78 = arith.minsi %77, %c1_i32_62 : i32
    %79 = arith.index_cast %78 : i32 to index
    %c0_63 = arith.constant 0 : index
    %80 = memref.load %arg1[%79, %c0_63] : memref<2x2xi32, #tpu.memory_space<smem>>
    %81 = arith.index_cast %78 : i32 to index
    %c1_64 = arith.constant 1 : index
    %82 = memref.load %arg1[%81, %c1_64] : memref<2x2xi32, #tpu.memory_space<smem>>
    %c8_i32_65 = arith.constant 8 : i32
    %83 = arith.muli %78, %c8_i32_65 : i32
    %84 = arith.addi %83, %80 : i32
    %c8_i32_66 = arith.constant 8 : i32
    %85 = arith.muli %78, %c8_i32_66 : i32
    %86 = arith.addi %85, %82 : i32
    %c4_i32_67 = arith.constant 4 : i32
    %c0_i32_68 = arith.constant 0 : i32
    %c0_i32_69 = arith.constant 0 : i32
    %87 = tpu.memref_slice %arg2[%84, %c0_i32_69] : memref<16x32xf32, #tpu.memory_space<any>> -> memref<1x32xf32, #tpu.memory_space<any>>
    %c4_i32_70 = arith.constant 4 : i32
    %c0_i32_71 = arith.constant 0 : i32
    %88 = tpu.memref_slice %arg6[%c4_i32_70, %c0_i32_71] : memref<8x32xf32, #tpu.memory_space<vmem>> -> memref<1x32xf32, #tpu.memory_space<vmem>>
    %89 = tpu.memref_slice %arg8[%c4_i32_67, %c0_i32_68] : memref<8x2x!tpu.dma_semaphore, #tpu.memory_space<semaphore_mem>> -> memref<1x1x!tpu.dma_semaphore, #tpu.memory_space<semaphore_mem>>
    %90 = tpu.memref_squeeze %89 : memref<1x1x!tpu.dma_semaphore, #tpu.memory_space<semaphore_mem>> -> memref<!tpu.dma_semaphore, #tpu.memory_space<semaphore_mem>>
    tpu.enqueue_dma source(%87 : memref<1x32xf32, #tpu.memory_space<any>>) target(%88 : memref<1x32xf32, #tpu.memory_space<vmem>>) target_semaphore(%90 : memref<!tpu.dma_semaphore, #tpu.memory_space<semaphore_mem>>)
    %c4_i32_72 = arith.constant 4 : i32
    %c1_i32_73 = arith.constant 1 : i32
    %c0_i32_74 = arith.constant 0 : i32
    %91 = tpu.memref_slice %arg2[%86, %c0_i32_74] : memref<16x32xf32, #tpu.memory_space<any>> -> memref<1x32xf32, #tpu.memory_space<any>>
    %c4_i32_75 = arith.constant 4 : i32
    %c0_i32_76 = arith.constant 0 : i32
    %92 = tpu.memref_slice %arg7[%c4_i32_75, %c0_i32_76] : memref<8x32xf32, #tpu.memory_space<vmem>> -> memref<1x32xf32, #tpu.memory_space<vmem>>
    %93 = tpu.memref_slice %arg8[%c4_i32_72, %c1_i32_73] : memref<8x2x!tpu.dma_semaphore, #tpu.memory_space<semaphore_mem>> -> memref<1x1x!tpu.dma_semaphore, #tpu.memory_space<semaphore_mem>>
    %94 = tpu.memref_squeeze %93 : memref<1x1x!tpu.dma_semaphore, #tpu.memory_space<semaphore_mem>> -> memref<!tpu.dma_semaphore, #tpu.memory_space<semaphore_mem>>
    tpu.enqueue_dma source(%91 : memref<1x32xf32, #tpu.memory_space<any>>) target(%92 : memref<1x32xf32, #tpu.memory_space<vmem>>) target_semaphore(%94 : memref<!tpu.dma_semaphore, #tpu.memory_space<semaphore_mem>>)
    %c8_i32_77 = arith.constant 8 : i32
    %95 = arith.muli %arg0, %c8_i32_77 : i32
    %c5_i32 = arith.constant 5 : i32
    %96 = arith.addi %95, %c5_i32 : i32
    %c1_i32_78 = arith.constant 1 : i32
    %97 = arith.minsi %96, %c1_i32_78 : i32
    %98 = arith.index_cast %97 : i32 to index
    %c0_79 = arith.constant 0 : index
    %99 = memref.load %arg1[%98, %c0_79] : memref<2x2xi32, #tpu.memory_space<smem>>
    %100 = arith.index_cast %97 : i32 to index
    %c1_80 = arith.constant 1 : index
    %101 = memref.load %arg1[%100, %c1_80] : memref<2x2xi32, #tpu.memory_space<smem>>
    %c8_i32_81 = arith.constant 8 : i32
    %102 = arith.muli %97, %c8_i32_81 : i32
    %103 = arith.addi %102, %99 : i32
    %c8_i32_82 = arith.constant 8 : i32
    %104 = arith.muli %97, %c8_i32_82 : i32
    %105 = arith.addi %104, %101 : i32
    %c5_i32_83 = arith.constant 5 : i32
    %c0_i32_84 = arith.constant 0 : i32
    %c0_i32_85 = arith.constant 0 : i32
    %106 = tpu.memref_slice %arg2[%103, %c0_i32_85] : memref<16x32xf32, #tpu.memory_space<any>> -> memref<1x32xf32, #tpu.memory_space<any>>
    %c5_i32_86 = arith.constant 5 : i32
    %c0_i32_87 = arith.constant 0 : i32
    %107 = tpu.memref_slice %arg6[%c5_i32_86, %c0_i32_87] : memref<8x32xf32, #tpu.memory_space<vmem>> -> memref<1x32xf32, #tpu.memory_space<vmem>>
    %108 = tpu.memref_slice %arg8[%c5_i32_83, %c0_i32_84] : memref<8x2x!tpu.dma_semaphore, #tpu.memory_space<semaphore_mem>> -> memref<1x1x!tpu.dma_semaphore, #tpu.memory_space<semaphore_mem>>
    %109 = tpu.memref_squeeze %108 : memref<1x1x!tpu.dma_semaphore, #tpu.memory_space<semaphore_mem>> -> memref<!tpu.dma_semaphore, #tpu.memory_space<semaphore_mem>>
    tpu.enqueue_dma source(%106 : memref<1x32xf32, #tpu.memory_space<any>>) target(%107 : memref<1x32xf32, #tpu.memory_space<vmem>>) target_semaphore(%109 : memref<!tpu.dma_semaphore, #tpu.memory_space<semaphore_mem>>)
    %c5_i32_88 = arith.constant 5 : i32
    %c1_i32_89 = arith.constant 1 : i32
    %c0_i32_90 = arith.constant 0 : i32
    %110 = tpu.memref_slice %arg2[%105, %c0_i32_90] : memref<16x32xf32, #tpu.memory_space<any>> -> memref<1x32xf32, #tpu.memory_space<any>>
    %c5_i32_91 = arith.constant 5 : i32
    %c0_i32_92 = arith.constant 0 : i32
    %111 = tpu.memref_slice %arg7[%c5_i32_91, %c0_i32_92] : memref<8x32xf32, #tpu.memory_space<vmem>> -> memref<1x32xf32, #tpu.memory_space<vmem>>
    %112 = tpu.memref_slice %arg8[%c5_i32_88, %c1_i32_89] : memref<8x2x!tpu.dma_semaphore, #tpu.memory_space<semaphore_mem>> -> memref<1x1x!tpu.dma_semaphore, #tpu.memory_space<semaphore_mem>>
    %113 = tpu.memref_squeeze %112 : memref<1x1x!tpu.dma_semaphore, #tpu.memory_space<semaphore_mem>> -> memref<!tpu.dma_semaphore, #tpu.memory_space<semaphore_mem>>
    tpu.enqueue_dma source(%110 : memref<1x32xf32, #tpu.memory_space<any>>) target(%111 : memref<1x32xf32, #tpu.memory_space<vmem>>) target_semaphore(%113 : memref<!tpu.dma_semaphore, #tpu.memory_space<semaphore_mem>>)
    %c8_i32_93 = arith.constant 8 : i32
    %114 = arith.muli %arg0, %c8_i32_93 : i32
    %c6_i32 = arith.constant 6 : i32
    %115 = arith.addi %114, %c6_i32 : i32
    %c1_i32_94 = arith.constant 1 : i32
    %116 = arith.minsi %115, %c1_i32_94 : i32
    %117 = arith.index_cast %116 : i32 to index
    %c0_95 = arith.constant 0 : index
    %118 = memref.load %arg1[%117, %c0_95] : memref<2x2xi32, #tpu.memory_space<smem>>
    %119 = arith.index_cast %116 : i32 to index
    %c1_96 = arith.constant 1 : index
    %120 = memref.load %arg1[%119, %c1_96] : memref<2x2xi32, #tpu.memory_space<smem>>
    %c8_i32_97 = arith.constant 8 : i32
    %121 = arith.muli %116, %c8_i32_97 : i32
    %122 = arith.addi %121, %118 : i32
    %c8_i32_98 = arith.constant 8 : i32
    %123 = arith.muli %116, %c8_i32_98 : i32
    %124 = arith.addi %123, %120 : i32
    %c6_i32_99 = arith.constant 6 : i32
    %c0_i32_100 = arith.constant 0 : i32
    %c0_i32_101 = arith.constant 0 : i32
    %125 = tpu.memref_slice %arg2[%122, %c0_i32_101] : memref<16x32xf32, #tpu.memory_space<any>> -> memref<1x32xf32, #tpu.memory_space<any>>
    %c6_i32_102 = arith.constant 6 : i32
    %c0_i32_103 = arith.constant 0 : i32
    %126 = tpu.memref_slice %arg6[%c6_i32_102, %c0_i32_103] : memref<8x32xf32, #tpu.memory_space<vmem>> -> memref<1x32xf32, #tpu.memory_space<vmem>>
    %127 = tpu.memref_slice %arg8[%c6_i32_99, %c0_i32_100] : memref<8x2x!tpu.dma_semaphore, #tpu.memory_space<semaphore_mem>> -> memref<1x1x!tpu.dma_semaphore, #tpu.memory_space<semaphore_mem>>
    %128 = tpu.memref_squeeze %127 : memref<1x1x!tpu.dma_semaphore, #tpu.memory_space<semaphore_mem>> -> memref<!tpu.dma_semaphore, #tpu.memory_space<semaphore_mem>>
    tpu.enqueue_dma source(%125 : memref<1x32xf32, #tpu.memory_space<any>>) target(%126 : memref<1x32xf32, #tpu.memory_space<vmem>>) target_semaphore(%128 : memref<!tpu.dma_semaphore, #tpu.memory_space<semaphore_mem>>)
    %c6_i32_104 = arith.constant 6 : i32
    %c1_i32_105 = arith.constant 1 : i32
    %c0_i32_106 = arith.constant 0 : i32
    %129 = tpu.memref_slice %arg2[%124, %c0_i32_106] : memref<16x32xf32, #tpu.memory_space<any>> -> memref<1x32xf32, #tpu.memory_space<any>>
    %c6_i32_107 = arith.constant 6 : i32
    %c0_i32_108 = arith.constant 0 : i32
    %130 = tpu.memref_slice %arg7[%c6_i32_107, %c0_i32_108] : memref<8x32xf32, #tpu.memory_space<vmem>> -> memref<1x32xf32, #tpu.memory_space<vmem>>
    %131 = tpu.memref_slice %arg8[%c6_i32_104, %c1_i32_105] : memref<8x2x!tpu.dma_semaphore, #tpu.memory_space<semaphore_mem>> -> memref<1x1x!tpu.dma_semaphore, #tpu.memory_space<semaphore_mem>>
    %132 = tpu.memref_squeeze %131 : memref<1x1x!tpu.dma_semaphore, #tpu.memory_space<semaphore_mem>> -> memref<!tpu.dma_semaphore, #tpu.memory_space<semaphore_mem>>
    tpu.enqueue_dma source(%129 : memref<1x32xf32, #tpu.memory_space<any>>) target(%130 : memref<1x32xf32, #tpu.memory_space<vmem>>) target_semaphore(%132 : memref<!tpu.dma_semaphore, #tpu.memory_space<semaphore_mem>>)
    %c8_i32_109 = arith.constant 8 : i32
    %133 = arith.muli %arg0, %c8_i32_109 : i32
    %c7_i32 = arith.constant 7 : i32
    %134 = arith.addi %133, %c7_i32 : i32
    %c1_i32_110 = arith.constant 1 : i32
    %135 = arith.minsi %134, %c1_i32_110 : i32
    %136 = arith.index_cast %135 : i32 to index
    %c0_111 = arith.constant 0 : index
    %137 = memref.load %arg1[%136, %c0_111] : memref<2x2xi32, #tpu.memory_space<smem>>
    %138 = arith.index_cast %135 : i32 to index
    %c1_112 = arith.constant 1 : index
    %139 = memref.load %arg1[%138, %c1_112] : memref<2x2xi32, #tpu.memory_space<smem>>
    %c8_i32_113 = arith.constant 8 : i32
    %140 = arith.muli %135, %c8_i32_113 : i32
    %141 = arith.addi %140, %137 : i32
    %c8_i32_114 = arith.constant 8 : i32
    %142 = arith.muli %135, %c8_i32_114 : i32
    %143 = arith.addi %142, %139 : i32
    %c7_i32_115 = arith.constant 7 : i32
    %c0_i32_116 = arith.constant 0 : i32
    %c0_i32_117 = arith.constant 0 : i32
    %144 = tpu.memref_slice %arg2[%141, %c0_i32_117] : memref<16x32xf32, #tpu.memory_space<any>> -> memref<1x32xf32, #tpu.memory_space<any>>
    %c7_i32_118 = arith.constant 7 : i32
    %c0_i32_119 = arith.constant 0 : i32
    %145 = tpu.memref_slice %arg6[%c7_i32_118, %c0_i32_119] : memref<8x32xf32, #tpu.memory_space<vmem>> -> memref<1x32xf32, #tpu.memory_space<vmem>>
    %146 = tpu.memref_slice %arg8[%c7_i32_115, %c0_i32_116] : memref<8x2x!tpu.dma_semaphore, #tpu.memory_space<semaphore_mem>> -> memref<1x1x!tpu.dma_semaphore, #tpu.memory_space<semaphore_mem>>
    %147 = tpu.memref_squeeze %146 : memref<1x1x!tpu.dma_semaphore, #tpu.memory_space<semaphore_mem>> -> memref<!tpu.dma_semaphore, #tpu.memory_space<semaphore_mem>>
    tpu.enqueue_dma source(%144 : memref<1x32xf32, #tpu.memory_space<any>>) target(%145 : memref<1x32xf32, #tpu.memory_space<vmem>>) target_semaphore(%147 : memref<!tpu.dma_semaphore, #tpu.memory_space<semaphore_mem>>)
    %c7_i32_120 = arith.constant 7 : i32
    %c1_i32_121 = arith.constant 1 : i32
    %c0_i32_122 = arith.constant 0 : i32
    %148 = tpu.memref_slice %arg2[%143, %c0_i32_122] : memref<16x32xf32, #tpu.memory_space<any>> -> memref<1x32xf32, #tpu.memory_space<any>>
    %c7_i32_123 = arith.constant 7 : i32
    %c0_i32_124 = arith.constant 0 : i32
    %149 = tpu.memref_slice %arg7[%c7_i32_123, %c0_i32_124] : memref<8x32xf32, #tpu.memory_space<vmem>> -> memref<1x32xf32, #tpu.memory_space<vmem>>
    %150 = tpu.memref_slice %arg8[%c7_i32_120, %c1_i32_121] : memref<8x2x!tpu.dma_semaphore, #tpu.memory_space<semaphore_mem>> -> memref<1x1x!tpu.dma_semaphore, #tpu.memory_space<semaphore_mem>>
    %151 = tpu.memref_squeeze %150 : memref<1x1x!tpu.dma_semaphore, #tpu.memory_space<semaphore_mem>> -> memref<!tpu.dma_semaphore, #tpu.memory_space<semaphore_mem>>
    tpu.enqueue_dma source(%148 : memref<1x32xf32, #tpu.memory_space<any>>) target(%149 : memref<1x32xf32, #tpu.memory_space<vmem>>) target_semaphore(%151 : memref<!tpu.dma_semaphore, #tpu.memory_space<semaphore_mem>>)
    %c0_i32_125 = arith.constant 0 : i32
    %c0_i32_126 = arith.constant 0 : i32
    %c0_i32_127 = arith.constant 0 : i32
    %152 = tpu.memref_slice %arg2[%8, %c0_i32_127] : memref<16x32xf32, #tpu.memory_space<any>> -> memref<1x32xf32, #tpu.memory_space<any>>
    %c0_i32_128 = arith.constant 0 : i32
    %c0_i32_129 = arith.constant 0 : i32
    %153 = tpu.memref_slice %arg6[%c0_i32_128, %c0_i32_129] : memref<8x32xf32, #tpu.memory_space<vmem>> -> memref<1x32xf32, #tpu.memory_space<vmem>>
    %154 = tpu.memref_slice %arg8[%c0_i32_125, %c0_i32_126] : memref<8x2x!tpu.dma_semaphore, #tpu.memory_space<semaphore_mem>> -> memref<1x1x!tpu.dma_semaphore, #tpu.memory_space<semaphore_mem>>
    %155 = tpu.memref_squeeze %154 : memref<1x1x!tpu.dma_semaphore, #tpu.memory_space<semaphore_mem>> -> memref<!tpu.dma_semaphore, #tpu.memory_space<semaphore_mem>>
    tpu.wait_dma2 semaphore(%155 : memref<!tpu.dma_semaphore, #tpu.memory_space<semaphore_mem>>) src(%152 : memref<1x32xf32, #tpu.memory_space<any>>) dst(%153 : memref<1x32xf32, #tpu.memory_space<vmem>>)
    %c1_i32_130 = arith.constant 1 : i32
    %c0_i32_131 = arith.constant 0 : i32
    %c0_i32_132 = arith.constant 0 : i32
    %156 = tpu.memref_slice %arg2[%27, %c0_i32_132] : memref<16x32xf32, #tpu.memory_space<any>> -> memref<1x32xf32, #tpu.memory_space<any>>
    %c1_i32_133 = arith.constant 1 : i32
    %c0_i32_134 = arith.constant 0 : i32
    %157 = tpu.memref_slice %arg6[%c1_i32_133, %c0_i32_134] : memref<8x32xf32, #tpu.memory_space<vmem>> -> memref<1x32xf32, #tpu.memory_space<vmem>>
    %158 = tpu.memref_slice %arg8[%c1_i32_130, %c0_i32_131] : memref<8x2x!tpu.dma_semaphore, #tpu.memory_space<semaphore_mem>> -> memref<1x1x!tpu.dma_semaphore, #tpu.memory_space<semaphore_mem>>
    %159 = tpu.memref_squeeze %158 : memref<1x1x!tpu.dma_semaphore, #tpu.memory_space<semaphore_mem>> -> memref<!tpu.dma_semaphore, #tpu.memory_space<semaphore_mem>>
    tpu.wait_dma2 semaphore(%159 : memref<!tpu.dma_semaphore, #tpu.memory_space<semaphore_mem>>) src(%156 : memref<1x32xf32, #tpu.memory_space<any>>) dst(%157 : memref<1x32xf32, #tpu.memory_space<vmem>>)
    %c2_i32_135 = arith.constant 2 : i32
    %c0_i32_136 = arith.constant 0 : i32
    %c0_i32_137 = arith.constant 0 : i32
    %160 = tpu.memref_slice %arg2[%46, %c0_i32_137] : memref<16x32xf32, #tpu.memory_space<any>> -> memref<1x32xf32, #tpu.memory_space<any>>
    %c2_i32_138 = arith.constant 2 : i32
    %c0_i32_139 = arith.constant 0 : i32
    %161 = tpu.memref_slice %arg6[%c2_i32_138, %c0_i32_139] : memref<8x32xf32, #tpu.memory_space<vmem>> -> memref<1x32xf32, #tpu.memory_space<vmem>>
    %162 = tpu.memref_slice %arg8[%c2_i32_135, %c0_i32_136] : memref<8x2x!tpu.dma_semaphore, #tpu.memory_space<semaphore_mem>> -> memref<1x1x!tpu.dma_semaphore, #tpu.memory_space<semaphore_mem>>
    %163 = tpu.memref_squeeze %162 : memref<1x1x!tpu.dma_semaphore, #tpu.memory_space<semaphore_mem>> -> memref<!tpu.dma_semaphore, #tpu.memory_space<semaphore_mem>>
    tpu.wait_dma2 semaphore(%163 : memref<!tpu.dma_semaphore, #tpu.memory_space<semaphore_mem>>) src(%160 : memref<1x32xf32, #tpu.memory_space<any>>) dst(%161 : memref<1x32xf32, #tpu.memory_space<vmem>>)
    %c3_i32_140 = arith.constant 3 : i32
    %c0_i32_141 = arith.constant 0 : i32
    %c0_i32_142 = arith.constant 0 : i32
    %164 = tpu.memref_slice %arg2[%65, %c0_i32_142] : memref<16x32xf32, #tpu.memory_space<any>> -> memref<1x32xf32, #tpu.memory_space<any>>
    %c3_i32_143 = arith.constant 3 : i32
    %c0_i32_144 = arith.constant 0 : i32
    %165 = tpu.memref_slice %arg6[%c3_i32_143, %c0_i32_144] : memref<8x32xf32, #tpu.memory_space<vmem>> -> memref<1x32xf32, #tpu.memory_space<vmem>>
    %166 = tpu.memref_slice %arg8[%c3_i32_140, %c0_i32_141] : memref<8x2x!tpu.dma_semaphore, #tpu.memory_space<semaphore_mem>> -> memref<1x1x!tpu.dma_semaphore, #tpu.memory_space<semaphore_mem>>
    %167 = tpu.memref_squeeze %166 : memref<1x1x!tpu.dma_semaphore, #tpu.memory_space<semaphore_mem>> -> memref<!tpu.dma_semaphore, #tpu.memory_space<semaphore_mem>>
    tpu.wait_dma2 semaphore(%167 : memref<!tpu.dma_semaphore, #tpu.memory_space<semaphore_mem>>) src(%164 : memref<1x32xf32, #tpu.memory_space<any>>) dst(%165 : memref<1x32xf32, #tpu.memory_space<vmem>>)
    %c4_i32_145 = arith.constant 4 : i32
    %c0_i32_146 = arith.constant 0 : i32
    %c0_i32_147 = arith.constant 0 : i32
    %168 = tpu.memref_slice %arg2[%84, %c0_i32_147] : memref<16x32xf32, #tpu.memory_space<any>> -> memref<1x32xf32, #tpu.memory_space<any>>
    %c4_i32_148 = arith.constant 4 : i32
    %c0_i32_149 = arith.constant 0 : i32
    %169 = tpu.memref_slice %arg6[%c4_i32_148, %c0_i32_149] : memref<8x32xf32, #tpu.memory_space<vmem>> -> memref<1x32xf32, #tpu.memory_space<vmem>>
    %170 = tpu.memref_slice %arg8[%c4_i32_145, %c0_i32_146] : memref<8x2x!tpu.dma_semaphore, #tpu.memory_space<semaphore_mem>> -> memref<1x1x!tpu.dma_semaphore, #tpu.memory_space<semaphore_mem>>
    %171 = tpu.memref_squeeze %170 : memref<1x1x!tpu.dma_semaphore, #tpu.memory_space<semaphore_mem>> -> memref<!tpu.dma_semaphore, #tpu.memory_space<semaphore_mem>>
    tpu.wait_dma2 semaphore(%171 : memref<!tpu.dma_semaphore, #tpu.memory_space<semaphore_mem>>) src(%168 : memref<1x32xf32, #tpu.memory_space<any>>) dst(%169 : memref<1x32xf32, #tpu.memory_space<vmem>>)
    %c5_i32_150 = arith.constant 5 : i32
    %c0_i32_151 = arith.constant 0 : i32
    %c0_i32_152 = arith.constant 0 : i32
    %172 = tpu.memref_slice %arg2[%103, %c0_i32_152] : memref<16x32xf32, #tpu.memory_space<any>> -> memref<1x32xf32, #tpu.memory_space<any>>
    %c5_i32_153 = arith.constant 5 : i32
    %c0_i32_154 = arith.constant 0 : i32
    %173 = tpu.memref_slice %arg6[%c5_i32_153, %c0_i32_154] : memref<8x32xf32, #tpu.memory_space<vmem>> -> memref<1x32xf32, #tpu.memory_space<vmem>>
    %174 = tpu.memref_slice %arg8[%c5_i32_150, %c0_i32_151] : memref<8x2x!tpu.dma_semaphore, #tpu.memory_space<semaphore_mem>> -> memref<1x1x!tpu.dma_semaphore, #tpu.memory_space<semaphore_mem>>
    %175 = tpu.memref_squeeze %174 : memref<1x1x!tpu.dma_semaphore, #tpu.memory_space<semaphore_mem>> -> memref<!tpu.dma_semaphore, #tpu.memory_space<semaphore_mem>>
    tpu.wait_dma2 semaphore(%175 : memref<!tpu.dma_semaphore, #tpu.memory_space<semaphore_mem>>) src(%172 : memref<1x32xf32, #tpu.memory_space<any>>) dst(%173 : memref<1x32xf32, #tpu.memory_space<vmem>>)
    %c6_i32_155 = arith.constant 6 : i32
    %c0_i32_156 = arith.constant 0 : i32
    %c0_i32_157 = arith.constant 0 : i32
    %176 = tpu.memref_slice %arg2[%122, %c0_i32_157] : memref<16x32xf32, #tpu.memory_space<any>> -> memref<1x32xf32, #tpu.memory_space<any>>
    %c6_i32_158 = arith.constant 6 : i32
    %c0_i32_159 = arith.constant 0 : i32
    %177 = tpu.memref_slice %arg6[%c6_i32_158, %c0_i32_159] : memref<8x32xf32, #tpu.memory_space<vmem>> -> memref<1x32xf32, #tpu.memory_space<vmem>>
    %178 = tpu.memref_slice %arg8[%c6_i32_155, %c0_i32_156] : memref<8x2x!tpu.dma_semaphore, #tpu.memory_space<semaphore_mem>> -> memref<1x1x!tpu.dma_semaphore, #tpu.memory_space<semaphore_mem>>
    %179 = tpu.memref_squeeze %178 : memref<1x1x!tpu.dma_semaphore, #tpu.memory_space<semaphore_mem>> -> memref<!tpu.dma_semaphore, #tpu.memory_space<semaphore_mem>>
    tpu.wait_dma2 semaphore(%179 : memref<!tpu.dma_semaphore, #tpu.memory_space<semaphore_mem>>) src(%176 : memref<1x32xf32, #tpu.memory_space<any>>) dst(%177 : memref<1x32xf32, #tpu.memory_space<vmem>>)
    %c7_i32_160 = arith.constant 7 : i32
    %c0_i32_161 = arith.constant 0 : i32
    %c0_i32_162 = arith.constant 0 : i32
    %180 = tpu.memref_slice %arg2[%141, %c0_i32_162] : memref<16x32xf32, #tpu.memory_space<any>> -> memref<1x32xf32, #tpu.memory_space<any>>
    %c7_i32_163 = arith.constant 7 : i32
    %c0_i32_164 = arith.constant 0 : i32
    %181 = tpu.memref_slice %arg6[%c7_i32_163, %c0_i32_164] : memref<8x32xf32, #tpu.memory_space<vmem>> -> memref<1x32xf32, #tpu.memory_space<vmem>>
    %182 = tpu.memref_slice %arg8[%c7_i32_160, %c0_i32_161] : memref<8x2x!tpu.dma_semaphore, #tpu.memory_space<semaphore_mem>> -> memref<1x1x!tpu.dma_semaphore, #tpu.memory_space<semaphore_mem>>
    %183 = tpu.memref_squeeze %182 : memref<1x1x!tpu.dma_semaphore, #tpu.memory_space<semaphore_mem>> -> memref<!tpu.dma_semaphore, #tpu.memory_space<semaphore_mem>>
    tpu.wait_dma2 semaphore(%183 : memref<!tpu.dma_semaphore, #tpu.memory_space<semaphore_mem>>) src(%180 : memref<1x32xf32, #tpu.memory_space<any>>) dst(%181 : memref<1x32xf32, #tpu.memory_space<vmem>>)
    %c0_165 = arith.constant 0 : index
    %c0_166 = arith.constant 0 : index
    %184 = vector.load %arg6[%c0_165, %c0_166] : memref<8x32xf32, #tpu.memory_space<vmem>>, vector<8x32xf32>
    %c0_167 = arith.constant 0 : index
    %c0_168 = arith.constant 0 : index
    %c0_169 = arith.constant 0 : index
    %185 = vector.load %arg3[%c0_167, %c0_168, %c0_169] : memref<2x32x128xf32, #tpu.memory_space<vmem>>, vector<1x32x128xf32>
    %186 = vector.shape_cast %185 : vector<1x32x128xf32> to vector<32x128xf32>
    %cst = arith.constant dense<0.000000e+00> : vector<8x128xf32>
    %187 = tpu.matmul %184, %186, %cst {dimension_numbers = #tpu.dot_dimension_numbers<[1], [0], [0], [1], [0, 0, 1, 1], [], []>} : vector<8x32xf32>, vector<32x128xf32>, vector<8x128xf32> -> vector<8x128xf32>
    %c0_170 = arith.constant 0 : index
    %c0_171 = arith.constant 0 : index
    %188 = vector.load %arg4[%c0_170, %c0_171] : memref<1x128xf32, #tpu.memory_space<vmem>>, vector<1x128xf32>
    %189 = vector.broadcast %188 : vector<1x128xf32> to vector<8x128xf32>
    %190 = arith.addf %187, %189 : vector<8x128xf32>
    %c0_i32_172 = arith.constant 0 : i32
    %c1_i32_173 = arith.constant 1 : i32
    %c0_i32_174 = arith.constant 0 : i32
    %191 = tpu.memref_slice %arg2[%10, %c0_i32_174] : memref<16x32xf32, #tpu.memory_space<any>> -> memref<1x32xf32, #tpu.memory_space<any>>
    %c0_i32_175 = arith.constant 0 : i32
    %c0_i32_176 = arith.constant 0 : i32
    %192 = tpu.memref_slice %arg7[%c0_i32_175, %c0_i32_176] : memref<8x32xf32, #tpu.memory_space<vmem>> -> memref<1x32xf32, #tpu.memory_space<vmem>>
    %193 = tpu.memref_slice %arg8[%c0_i32_172, %c1_i32_173] : memref<8x2x!tpu.dma_semaphore, #tpu.memory_space<semaphore_mem>> -> memref<1x1x!tpu.dma_semaphore, #tpu.memory_space<semaphore_mem>>
    %194 = tpu.memref_squeeze %193 : memref<1x1x!tpu.dma_semaphore, #tpu.memory_space<semaphore_mem>> -> memref<!tpu.dma_semaphore, #tpu.memory_space<semaphore_mem>>
    tpu.wait_dma2 semaphore(%194 : memref<!tpu.dma_semaphore, #tpu.memory_space<semaphore_mem>>) src(%191 : memref<1x32xf32, #tpu.memory_space<any>>) dst(%192 : memref<1x32xf32, #tpu.memory_space<vmem>>)
    %c1_i32_177 = arith.constant 1 : i32
    %c1_i32_178 = arith.constant 1 : i32
    %c0_i32_179 = arith.constant 0 : i32
    %195 = tpu.memref_slice %arg2[%29, %c0_i32_179] : memref<16x32xf32, #tpu.memory_space<any>> -> memref<1x32xf32, #tpu.memory_space<any>>
    %c1_i32_180 = arith.constant 1 : i32
    %c0_i32_181 = arith.constant 0 : i32
    %196 = tpu.memref_slice %arg7[%c1_i32_180, %c0_i32_181] : memref<8x32xf32, #tpu.memory_space<vmem>> -> memref<1x32xf32, #tpu.memory_space<vmem>>
    %197 = tpu.memref_slice %arg8[%c1_i32_177, %c1_i32_178] : memref<8x2x!tpu.dma_semaphore, #tpu.memory_space<semaphore_mem>> -> memref<1x1x!tpu.dma_semaphore, #tpu.memory_space<semaphore_mem>>
    %198 = tpu.memref_squeeze %197 : memref<1x1x!tpu.dma_semaphore, #tpu.memory_space<semaphore_mem>> -> memref<!tpu.dma_semaphore, #tpu.memory_space<semaphore_mem>>
    tpu.wait_dma2 semaphore(%198 : memref<!tpu.dma_semaphore, #tpu.memory_space<semaphore_mem>>) src(%195 : memref<1x32xf32, #tpu.memory_space<any>>) dst(%196 : memref<1x32xf32, #tpu.memory_space<vmem>>)
    %c2_i32_182 = arith.constant 2 : i32
    %c1_i32_183 = arith.constant 1 : i32
    %c0_i32_184 = arith.constant 0 : i32
    %199 = tpu.memref_slice %arg2[%48, %c0_i32_184] : memref<16x32xf32, #tpu.memory_space<any>> -> memref<1x32xf32, #tpu.memory_space<any>>
    %c2_i32_185 = arith.constant 2 : i32
    %c0_i32_186 = arith.constant 0 : i32
    %200 = tpu.memref_slice %arg7[%c2_i32_185, %c0_i32_186] : memref<8x32xf32, #tpu.memory_space<vmem>> -> memref<1x32xf32, #tpu.memory_space<vmem>>
    %201 = tpu.memref_slice %arg8[%c2_i32_182, %c1_i32_183] : memref<8x2x!tpu.dma_semaphore, #tpu.memory_space<semaphore_mem>> -> memref<1x1x!tpu.dma_semaphore, #tpu.memory_space<semaphore_mem>>
    %202 = tpu.memref_squeeze %201 : memref<1x1x!tpu.dma_semaphore, #tpu.memory_space<semaphore_mem>> -> memref<!tpu.dma_semaphore, #tpu.memory_space<semaphore_mem>>
    tpu.wait_dma2 semaphore(%202 : memref<!tpu.dma_semaphore, #tpu.memory_space<semaphore_mem>>) src(%199 : memref<1x32xf32, #tpu.memory_space<any>>) dst(%200 : memref<1x32xf32, #tpu.memory_space<vmem>>)
    %c3_i32_187 = arith.constant 3 : i32
    %c1_i32_188 = arith.constant 1 : i32
    %c0_i32_189 = arith.constant 0 : i32
    %203 = tpu.memref_slice %arg2[%67, %c0_i32_189] : memref<16x32xf32, #tpu.memory_space<any>> -> memref<1x32xf32, #tpu.memory_space<any>>
    %c3_i32_190 = arith.constant 3 : i32
    %c0_i32_191 = arith.constant 0 : i32
    %204 = tpu.memref_slice %arg7[%c3_i32_190, %c0_i32_191] : memref<8x32xf32, #tpu.memory_space<vmem>> -> memref<1x32xf32, #tpu.memory_space<vmem>>
    %205 = tpu.memref_slice %arg8[%c3_i32_187, %c1_i32_188] : memref<8x2x!tpu.dma_semaphore, #tpu.memory_space<semaphore_mem>> -> memref<1x1x!tpu.dma_semaphore, #tpu.memory_space<semaphore_mem>>
    %206 = tpu.memref_squeeze %205 : memref<1x1x!tpu.dma_semaphore, #tpu.memory_space<semaphore_mem>> -> memref<!tpu.dma_semaphore, #tpu.memory_space<semaphore_mem>>
    tpu.wait_dma2 semaphore(%206 : memref<!tpu.dma_semaphore, #tpu.memory_space<semaphore_mem>>) src(%203 : memref<1x32xf32, #tpu.memory_space<any>>) dst(%204 : memref<1x32xf32, #tpu.memory_space<vmem>>)
    %c4_i32_192 = arith.constant 4 : i32
    %c1_i32_193 = arith.constant 1 : i32
    %c0_i32_194 = arith.constant 0 : i32
    %207 = tpu.memref_slice %arg2[%86, %c0_i32_194] : memref<16x32xf32, #tpu.memory_space<any>> -> memref<1x32xf32, #tpu.memory_space<any>>
    %c4_i32_195 = arith.constant 4 : i32
    %c0_i32_196 = arith.constant 0 : i32
    %208 = tpu.memref_slice %arg7[%c4_i32_195, %c0_i32_196] : memref<8x32xf32, #tpu.memory_space<vmem>> -> memref<1x32xf32, #tpu.memory_space<vmem>>
    %209 = tpu.memref_slice %arg8[%c4_i32_192, %c1_i32_193] : memref<8x2x!tpu.dma_semaphore, #tpu.memory_space<semaphore_mem>> -> memref<1x1x!tpu.dma_semaphore, #tpu.memory_space<semaphore_mem>>
    %210 = tpu.memref_squeeze %209 : memref<1x1x!tpu.dma_semaphore, #tpu.memory_space<semaphore_mem>> -> memref<!tpu.dma_semaphore, #tpu.memory_space<semaphore_mem>>
    tpu.wait_dma2 semaphore(%210 : memref<!tpu.dma_semaphore, #tpu.memory_space<semaphore_mem>>) src(%207 : memref<1x32xf32, #tpu.memory_space<any>>) dst(%208 : memref<1x32xf32, #tpu.memory_space<vmem>>)
    %c5_i32_197 = arith.constant 5 : i32
    %c1_i32_198 = arith.constant 1 : i32
    %c0_i32_199 = arith.constant 0 : i32
    %211 = tpu.memref_slice %arg2[%105, %c0_i32_199] : memref<16x32xf32, #tpu.memory_space<any>> -> memref<1x32xf32, #tpu.memory_space<any>>
    %c5_i32_200 = arith.constant 5 : i32
    %c0_i32_201 = arith.constant 0 : i32
    %212 = tpu.memref_slice %arg7[%c5_i32_200, %c0_i32_201] : memref<8x32xf32, #tpu.memory_space<vmem>> -> memref<1x32xf32, #tpu.memory_space<vmem>>
    %213 = tpu.memref_slice %arg8[%c5_i32_197, %c1_i32_198] : memref<8x2x!tpu.dma_semaphore, #tpu.memory_space<semaphore_mem>> -> memref<1x1x!tpu.dma_semaphore, #tpu.memory_space<semaphore_mem>>
    %214 = tpu.memref_squeeze %213 : memref<1x1x!tpu.dma_semaphore, #tpu.memory_space<semaphore_mem>> -> memref<!tpu.dma_semaphore, #tpu.memory_space<semaphore_mem>>
    tpu.wait_dma2 semaphore(%214 : memref<!tpu.dma_semaphore, #tpu.memory_space<semaphore_mem>>) src(%211 : memref<1x32xf32, #tpu.memory_space<any>>) dst(%212 : memref<1x32xf32, #tpu.memory_space<vmem>>)
    %c6_i32_202 = arith.constant 6 : i32
    %c1_i32_203 = arith.constant 1 : i32
    %c0_i32_204 = arith.constant 0 : i32
    %215 = tpu.memref_slice %arg2[%124, %c0_i32_204] : memref<16x32xf32, #tpu.memory_space<any>> -> memref<1x32xf32, #tpu.memory_space<any>>
    %c6_i32_205 = arith.constant 6 : i32
    %c0_i32_206 = arith.constant 0 : i32
    %216 = tpu.memref_slice %arg7[%c6_i32_205, %c0_i32_206] : memref<8x32xf32, #tpu.memory_space<vmem>> -> memref<1x32xf32, #tpu.memory_space<vmem>>
    %217 = tpu.memref_slice %arg8[%c6_i32_202, %c1_i32_203] : memref<8x2x!tpu.dma_semaphore, #tpu.memory_space<semaphore_mem>> -> memref<1x1x!tpu.dma_semaphore, #tpu.memory_space<semaphore_mem>>
    %218 = tpu.memref_squeeze %217 : memref<1x1x!tpu.dma_semaphore, #tpu.memory_space<semaphore_mem>> -> memref<!tpu.dma_semaphore, #tpu.memory_space<semaphore_mem>>
    tpu.wait_dma2 semaphore(%218 : memref<!tpu.dma_semaphore, #tpu.memory_space<semaphore_mem>>) src(%215 : memref<1x32xf32, #tpu.memory_space<any>>) dst(%216 : memref<1x32xf32, #tpu.memory_space<vmem>>)
    %c7_i32_207 = arith.constant 7 : i32
    %c1_i32_208 = arith.constant 1 : i32
    %c0_i32_209 = arith.constant 0 : i32
    %219 = tpu.memref_slice %arg2[%143, %c0_i32_209] : memref<16x32xf32, #tpu.memory_space<any>> -> memref<1x32xf32, #tpu.memory_space<any>>
    %c7_i32_210 = arith.constant 7 : i32
    %c0_i32_211 = arith.constant 0 : i32
    %220 = tpu.memref_slice %arg7[%c7_i32_210, %c0_i32_211] : memref<8x32xf32, #tpu.memory_space<vmem>> -> memref<1x32xf32, #tpu.memory_space<vmem>>
    %221 = tpu.memref_slice %arg8[%c7_i32_207, %c1_i32_208] : memref<8x2x!tpu.dma_semaphore, #tpu.memory_space<semaphore_mem>> -> memref<1x1x!tpu.dma_semaphore, #tpu.memory_space<semaphore_mem>>
    %222 = tpu.memref_squeeze %221 : memref<1x1x!tpu.dma_semaphore, #tpu.memory_space<semaphore_mem>> -> memref<!tpu.dma_semaphore, #tpu.memory_space<semaphore_mem>>
    tpu.wait_dma2 semaphore(%222 : memref<!tpu.dma_semaphore, #tpu.memory_space<semaphore_mem>>) src(%219 : memref<1x32xf32, #tpu.memory_space<any>>) dst(%220 : memref<1x32xf32, #tpu.memory_space<vmem>>)
    %c0_212 = arith.constant 0 : index
    %c0_213 = arith.constant 0 : index
    %223 = vector.load %arg7[%c0_212, %c0_213] : memref<8x32xf32, #tpu.memory_space<vmem>>, vector<8x32xf32>
    %c1_214 = arith.constant 1 : index
    %c0_215 = arith.constant 0 : index
    %c0_216 = arith.constant 0 : index
    %224 = vector.load %arg3[%c1_214, %c0_215, %c0_216] : memref<2x32x128xf32, #tpu.memory_space<vmem>>, vector<1x32x128xf32>
    %225 = vector.shape_cast %224 : vector<1x32x128xf32> to vector<32x128xf32>
    %cst_217 = arith.constant dense<0.000000e+00> : vector<8x128xf32>
    %226 = tpu.matmul %223, %225, %cst_217 {dimension_numbers = #tpu.dot_dimension_numbers<[1], [0], [0], [1], [0, 0, 1, 1], [], []>} : vector<8x32xf32>, vector<32x128xf32>, vector<8x128xf32> -> vector<8x128xf32>
    %227 = arith.addf %190, %226 : vector<8x128xf32>
    %c0_218 = arith.constant 0 : index
    %c0_219 = arith.constant 0 : index
    %228 = vector.load %arg5[%c0_218, %c0_219] : memref<8x128xf32, #tpu.memory_space<vmem>>, vector<8x128xf32>
    tpu.vector_store %arg5[%c0_218, %c0_219], %227 {strides = array<i32>} : memref<8x128xf32, #tpu.memory_space<vmem>>, vector<8x128xf32>,
    return
  }
  func.func @transform_1(%arg0: i32, %arg1: memref<2x2xi32, #tpu.memory_space<smem>>) -> (i32, i32, i32) {
    %c0_i32 = arith.constant 0 : i32
    %c0_i32_0 = arith.constant 0 : i32
    %c0_i32_1 = arith.constant 0 : i32
    %c0_i32_2 = arith.constant 0 : i32
    return %c0_i32, %c0_i32_0, %c0_i32_1 : i32, i32, i32
  }
  func.func @transform_2(%arg0: i32, %arg1: memref<2x2xi32, #tpu.memory_space<smem>>) -> (i32, i32) {
    %c0_i32 = arith.constant 0 : i32
    %c0_i32_0 = arith.constant 0 : i32
    %c0_i32_1 = arith.constant 0 : i32
    return %c0_i32, %c0_i32_0 : i32, i32
  }
  func.func @transform_3(%arg0: i32, %arg1: memref<2x2xi32, #tpu.memory_space<smem>>) -> (i32, i32) {
    %c0_i32 = arith.constant 0 : i32
    %c0_i32_0 = arith.constant 0 : i32
    return %arg0, %c0_i32 : i32, i32
  }
}

</mosaic_0001>

<bundles_post_ra>
// kernel: tpu_custom_call.1
= control target key start
LH: loop header
LB: loop body
LE: loop exit
PB: predicated region body
PF: predicated region fallthrough
CT: control target
= control target key end

     0   :  { %s1310_s15 = smov [#allocation6]   ;;  %s1535_s0 = inlined_call_operand.hbm [shape: s32[2,2], index: 0, kind: input, shape index: {}]   ;;  %s1536_s1 = inlined_call_operand.hbm [shape: f32[16,32], index: 1, kind: input, shape index: {}]   ;;  %s1537_s2 = inlined_call_operand.hbm [shape: f32[2,32,128], index: 2, kind: input, shape index: {}]   ;;  %s1538_s3 = inlined_call_operand.vmem [shape: f32[1,128], index: 3, kind: input, shape index: {}]   ;;  %s1539_s4 = inlined_call_operand.hbm [shape: f32[8,128], index: 4, kind: output, shape index: {}]  }
   0x1   :  { %10 = dma.hbm_to_smem %s1535_s0, 32, %s1310_s15, [#allocation5] }
   0x2   :  { %1272 = dma.done.wait [#allocation5], 32 }
   0x3   :  { %1273 = vsyncadd [#allocation5], 4294967264 }
   0x4   :  { %12 = sfence }
   0x5   :  { %13 = vsyncpa [#allocation8], 0 }
   0x6   :  { %14 = vsyncpa [#allocation9], 0  ;;  %s1311_s18 = smov [#allocation7]  }
   0x7   :  { %s20_s19 = sshll.u32 %s1311_s18, 4  ;;  %s21_s19 = int_to_ptr.vmem [resolvable:$true] %s20_s19 }
   0x8   :  { %s888_s20 = scalar_lea.vmem %s21_s19, 1024  ;;  %p893_p1 = scmp.lt.s32.totalorder %s21_s19, %s21_s19 }
   0x9   :  { %p889_p0 = scmp.ne.s32.totalorder %s21_s19, %s888_s20  ;;  %p894_p2 = scmp.lt.s32.totalorder %s888_s20, %s888_s20 }
   0xb   :  { %p895_p3 = por %p894_p2, %p893_p1 }
   0xd   :  { %p896_p4 = pnand %p895_p3, %p889_p0 }
   0xf   :  { %899 = shalt.err (!%p896_p4)
}
  0x10   :  { %s1312_s21 = smov 128   ;;  %s1313_s22 = smov 8  }
  0x11   :  { %26 = dma.hbm_to_vmem [thread:$0]  %s1537_s2, 1024, %s21_s19, [#allocation8], %s1312_s21, %s1312_s21, %s1313_s22  }
  0x12   :  { %1274 = dma.done.wait [#allocation8], 1024  }
  0x13   :  { %1275 = vsyncadd [#allocation8], 4294966272  ;;  %s36_s0 = sld [smem:[#allocation6]]  ;;  %s1314_s25 = smov [#allocation2]  }
  0x14   :  { %s51_s26 = sshll.u32 %s1314_s25, 4  ;;  %s1366_s27 = sld [smem:[#allocation6 + $0x1]]  ;;  %s1364_s26 = int_to_ptr.vmem [resolvable:$true] %s51_s26 }
  0x15   :  { %s1315_s28 = smov [#allocation3]   ;;  %s1368_s30 = sld [smem:[#allocation6 + $0x80]] }
  0x16   :  { %s65_s29 = sshll.u32 %s1315_s28, 4  ;;  %s1316_s5 = smov [#allocation2 + $0x1]   ;;  %s1370_s29 = int_to_ptr.vmem [resolvable:$true] %s65_s29 }
  0x17   :  { %s90_s6 = sshll.u32 %s1316_s5, 4  ;;  %s1372_s7 = sld [smem:[#allocation6 + $0x81]]  ;;  %s1374_s6 = int_to_ptr.vmem [resolvable:$true] %s90_s6 }
  0x18   :  { %s1317_s8 = smov [#allocation3 + $0x1]   ;;  %s1385_s17 = scalar_lea.hbm %s1536_s1, 256 }
  0x19   :  { %s740_s2 = sshll.u32 %s36_s0, 4  ;;  %s1376_s9 = sshll.u32 %s1317_s8, 4  ;;  %s106_s9 = int_to_ptr.vmem [resolvable:$true] %s1376_s9 }
  0x1a   :  { %s43_s12 = scalar_lea.hbm %s1536_s1, %s740_s2  ;;  %s741_s13 = sshll.u32 %s1366_s27, 4 }
  0x1b   :  { %s900_s14 = scalar_lea.hbm %s43_s12, 16  ;;  %p903_p6 = scmp.lt.s32.totalorder %s43_s12, %s1536_s1 }
  0x1c   :  { %p901_p5 = scmp.ne.s32.totalorder %s43_s12, %s900_s14  ;;  %p904_p7 = scmp.lt.s32.totalorder %s1385_s17, %s900_s14 }
  0x1e   :  { %p905_p8 = por %p904_p7, %p903_p6 }
  0x20   :  { %p906_p9 = pnand %p905_p8, %p901_p5 }
  0x22   :  { %909 = shalt.err (!%p906_p9)  }
  0x23   :  { %s910_s20 = scalar_lea.vmem %s1364_s26, 16  ;;  %s1394_s21 = scalar_lea.vmem %s1364_s26, 128 }
  0x24   :  { %p911_p10 = scmp.ne.s32.totalorder %s1364_s26, %s910_s20  ;;  %p915_p11 = scmp.lt.s32.totalorder %s1364_s26, %s1364_s26 }
  0x25   :  { %p916_p12 = scmp.lt.s32.totalorder %s1394_s21, %s910_s20 }
  0x27   :  { %p917_p13 = por %p916_p12, %p915_p11 }
  0x29   :  { %p918_p0 = pnand %p917_p13, %p911_p10 }
  0x2b   :  { %921 = shalt.err (!%p918_p0)  }
  0x2c   :  { %54 = dma.hbm_to_vmem [thread:$0]  %s43_s12, 16, %s1364_s26, [#allocation4] }
  0x2d   :  { %s56_s24 = scalar_lea.hbm %s1536_s1, %s741_s13  ;;  %s789_s0 = sshll.u32 %s1368_s30, 4 }
  0x2e   :  { %s922_s25 = scalar_lea.hbm %s56_s24, 16  ;;  %p925_p2 = scmp.lt.s32.totalorder %s56_s24, %s1536_s1 }
  0x2f   :  { %p923_p1 = scmp.ne.s32.totalorder %s56_s24, %s922_s25  ;;  %p926_p3 = scmp.lt.s32.totalorder %s1385_s17, %s922_s25 }
  0x31   :  { %p927_p4 = por %p926_p3, %p925_p2 }
  0x33   :  { %p928_p5 = pnand %p927_p4, %p923_p1 }
  0x35   :  { %931 = shalt.err (!%p928_p5)  }
  0x36   :  { %s932_s5 = scalar_lea.vmem %s1370_s29, 16  ;;  %s1411_s2 = scalar_lea.vmem %s1370_s29, 128 }
  0x37   :  { %p933_p6 = scmp.ne.s32.totalorder %s1370_s29, %s932_s5  ;;  %p937_p7 = scmp.lt.s32.totalorder %s1370_s29, %s1370_s29 }
  0x38   :  { %p938_p8 = scmp.lt.s32.totalorder %s1411_s2, %s932_s5 }
  0x3a   :  { %p939_p9 = por %p938_p8, %p937_p7 }
  0x3c   :  { %p940_p10 = pnand %p939_p9, %p933_p6 }
  0x3e   :  { %943 = shalt.err (!%p940_p10)  }
  0x3f   :  { %68 = dma.hbm_to_vmem [thread:$0]  %s56_s24, 16, %s1370_s29, [#allocation4 + $0x1] }
  0x40   :  { %s790_s30 = sadd.s32 128, %s789_s0  ;;  %s791_s8 = sshll.u32 %s1372_s7, 4 }
  0x41   :  { %s1421_s12 = scalar_lea.hbm %s1536_s1, %s790_s30  ;;  %s792_s13 = sadd.s32 128, %s791_s8 }
  0x42   :  { %s944_s14 = scalar_lea.hbm %s1421_s12, 16  ;;  %p947_p12 = scmp.lt.s32.totalorder %s1421_s12, %s1536_s1 }
  0x43   :  { %p945_p11 = scmp.ne.s32.totalorder %s1421_s12, %s944_s14  ;;  %p948_p13 = scmp.lt.s32.totalorder %s1385_s17, %s944_s14 }
  0x45   :  { %p949_p0 = por %p948_p13, %p947_p12 }
  0x47   :  { %p1430_p1 = pnand %p949_p0, %p945_p11 }
  0x49   :  { %953 = shalt.err (!%p1430_p1)  }
  0x4a   :  { %s954_s7 = scalar_lea.vmem %s1374_s6, 16  ;;  %p959_p3 = scmp.lt.s32.totalorder %s1374_s6, %s1364_s26 }
  0x4b   :  { %p955_p2 = scmp.ne.s32.totalorder %s1374_s6, %s954_s7  ;;  %p960_p4 = scmp.lt.s32.totalorder %s1394_s21, %s954_s7 }
  0x4d   :  { %p961_p5 = por %p960_p4, %p959_p3 }
  0x4f   :  { %p962_p6 = pnand %p961_p5, %p955_p2 }
  0x51   :  { %965 = shalt.err (!%p962_p6)  }
  0x52   :  { %93 = dma.hbm_to_vmem [thread:$0]  %s1421_s12, 16, %s1374_s6, [#allocation4 + $0x2] }
  0x53   :  { %s1446_s22 = scalar_lea.hbm %s1536_s1, %s792_s13 }
  0x54   :  { %s966_s23 = scalar_lea.hbm %s1446_s22, 16  ;;  %p969_p8 = scmp.lt.s32.totalorder %s1446_s22, %s1536_s1 }
  0x55   :  { %p967_p7 = scmp.ne.s32.totalorder %s1446_s22, %s966_s23  ;;  %p970_p9 = scmp.lt.s32.totalorder %s1385_s17, %s966_s23 }
  0x57   :  { %p971_p10 = por %p970_p9, %p969_p8 }
  0x59   :  { %p1456_p11 = pnand %p971_p10, %p967_p7 }
  0x5b   :  { %975 = shalt.err (!%p1456_p11)  }
  0x5c   :  { %s976_s6 = scalar_lea.vmem %s106_s9, 16  ;;  %p981_p13 = scmp.lt.s32.totalorder %s106_s9, %s1370_s29 }
  0x5d   :  { %p977_p12 = scmp.ne.s32.totalorder %s106_s9, %s976_s6  ;;  %p982_p0 = scmp.lt.s32.totalorder %s1411_s2, %s976_s6 }
  0x5f   :  { %p983_p2 = por %p982_p0, %p981_p13 }
  0x61   :  { %p984_p3 = pnand %p983_p2, %p977_p12 }
  0x63   :  { %987 = shalt.err (!%p984_p3)  }
  0x64   :  { %108 = dma.hbm_to_vmem [thread:$0]  %s1446_s22, 16, %s106_s9, [#allocation4 + $0x3] }
  0x65   :  { %s1318_s1 = smov [#allocation2 + $0x2]   ;;  %s1319_s27 = smov [#allocation3 + $0x2]  }
  0x66   :  { %s130_s17 = sshll.u32 %s1318_s1, 4  ;;  %s145_s28 = sshll.u32 %s1319_s27, 4  ;;  %s131_s17 = int_to_ptr.vmem [resolvable:$true] %s130_s17  ;;  %s146_s28 = int_to_ptr.vmem [resolvable:$true] %s145_s28 }
  0x67   :  { %997 = shalt.err (!%p1430_p1)  }
  0x68   :  { %s998_s5 = scalar_lea.vmem %s131_s17, 16  ;;  %p1003_p5 = scmp.lt.s32.totalorder %s131_s17, %s1364_s26 }
  0x69   :  { %p999_p4 = scmp.ne.s32.totalorder %s131_s17, %s998_s5  ;;  %p1004_p6 = scmp.lt.s32.totalorder %s1394_s21, %s998_s5 }
  0x6b   :  { %p1005_p7 = por %p1004_p6, %p1003_p5 }
  0x6d   :  { %p1006_p8 = pnand %p1005_p7, %p999_p4 }
  0x6f   :  { %1009 = shalt.err (!%p1006_p8)  }
  0x70   :  { %133 = dma.hbm_to_vmem [thread:$0]  %s1421_s12, 16, %s131_s17, [#allocation4 + $0x4] }
  0x71   :  { %1019 = shalt.err (!%p1456_p11)  }
  0x72   :  { %s1020_s9 = scalar_lea.vmem %s146_s28, 16  ;;  %p1025_p10 = scmp.lt.s32.totalorder %s146_s28, %s1370_s29 }
  0x73   :  { %p1021_p9 = scmp.ne.s32.totalorder %s146_s28, %s1020_s9  ;;  %p1026_p12 = scmp.lt.s32.totalorder %s1411_s2, %s1020_s9 }
  0x75   :  { %p1027_p13 = por %p1026_p12, %p1025_p10 }
  0x77   :  { %p1028_p0 = pnand %p1027_p13, %p1021_p9 }
  0x79   :  { %1031 = shalt.err (!%p1028_p0)  }
  0x7a   :  { %148 = dma.hbm_to_vmem [thread:$0]  %s1446_s22, 16, %s146_s28, [#allocation4 + $0x5] }
  0x7b   :  { %s1320_s30 = smov [#allocation2 + $0x3]   ;;  %s1321_s10 = smov [#allocation3 + $0x3]  }
  0x7c   :  { %s170_s8 = sshll.u32 %s1320_s30, 4  ;;  %s185_s11 = sshll.u32 %s1321_s10, 4  ;;  %s171_s8 = int_to_ptr.vmem [resolvable:$true] %s170_s8  ;;  %s186_s11 = int_to_ptr.vmem [resolvable:$true] %s185_s11 }
  0x7d   :  { %1041 = shalt.err (!%p1430_p1)  }
  0x7e   :  { %s1042_s13 = scalar_lea.vmem %s171_s8, 16  ;;  %p1047_p3 = scmp.lt.s32.totalorder %s171_s8, %s1364_s26 }
  0x7f   :  { %p1043_p2 = scmp.ne.s32.totalorder %s171_s8, %s1042_s13  ;;  %p1048_p4 = scmp.lt.s32.totalorder %s1394_s21, %s1042_s13 }
  0x81   :  { %p1049_p5 = por %p1048_p4, %p1047_p3 }
  0x83   :  { %p1050_p6 = pnand %p1049_p5, %p1043_p2 }
  0x85   :  { %1053 = shalt.err (!%p1050_p6)  }
  0x86   :  { %173 = dma.hbm_to_vmem [thread:$0]  %s1421_s12, 16, %s171_s8, [#allocation4 + $0x6] }
  0x87   :  { %1063 = shalt.err (!%p1456_p11)  }
  0x88   :  { %s1064_s14 = scalar_lea.vmem %s186_s11, 16  ;;  %p1069_p8 = scmp.lt.s32.totalorder %s186_s11, %s1370_s29 }
  0x89   :  { %p1065_p7 = scmp.ne.s32.totalorder %s186_s11, %s1064_s14  ;;  %p1070_p9 = scmp.lt.s32.totalorder %s1411_s2, %s1064_s14 }
  0x8b   :  { %p1071_p10 = por %p1070_p9, %p1069_p8 }
  0x8d   :  { %p1072_p12 = pnand %p1071_p10, %p1065_p7 }
  0x8f   :  { %1075 = shalt.err (!%p1072_p12)  }
  0x90   :  { %188 = dma.hbm_to_vmem [thread:$0]  %s1446_s22, 16, %s186_s11, [#allocation4 + $0x7] }
  0x91   :  { %s1322_s15 = smov [#allocation2 + $0x4]   ;;  %s1323_s7 = smov [#allocation3 + $0x4]  }
  0x92   :  { %s210_s16 = sshll.u32 %s1322_s15, 4  ;;  %s225_s19 = sshll.u32 %s1323_s7, 4  ;;  %s211_s16 = int_to_ptr.vmem [resolvable:$true] %s210_s16  ;;  %s226_s19 = int_to_ptr.vmem [resolvable:$true] %s225_s19 }
  0x93   :  { %1085 = shalt.err (!%p1430_p1)  }
  0x94   :  { %s1086_s20 = scalar_lea.vmem %s211_s16, 16  ;;  %p1091_p0 = scmp.lt.s32.totalorder %s211_s16, %s1364_s26 }
  0x95   :  { %p1087_p13 = scmp.ne.s32.totalorder %s211_s16, %s1086_s20  ;;  %p1092_p2 = scmp.lt.s32.totalorder %s1394_s21, %s1086_s20 }
  0x97   :  { %p1093_p3 = por %p1092_p2, %p1091_p0 }
  0x99   :  { %p1094_p4 = pnand %p1093_p3, %p1087_p13 }
  0x9b   :  { %1097 = shalt.err (!%p1094_p4)  }
  0x9c   :  { %213 = dma.hbm_to_vmem [thread:$0]  %s1421_s12, 16, %s211_s16, [#allocation4 + $0x8] }
  0x9d   :  { %1107 = shalt.err (!%p1456_p11)  }
  0x9e   :  { %s1108_s23 = scalar_lea.vmem %s226_s19, 16  ;;  %p1113_p6 = scmp.lt.s32.totalorder %s226_s19, %s1370_s29 }
  0x9f   :  { %p1109_p5 = scmp.ne.s32.totalorder %s226_s19, %s1108_s23  ;;  %p1114_p7 = scmp.lt.s32.totalorder %s1411_s2, %s1108_s23 }
  0xa1   :  { %p1115_p8 = por %p1114_p7, %p1113_p6 }
  0xa3   :  { %p1116_p9 = pnand %p1115_p8, %p1109_p5 }
  0xa5   :  { %1119 = shalt.err (!%p1116_p9)  }
  0xa6   :  { %228 = dma.hbm_to_vmem [thread:$0]  %s1446_s22, 16, %s226_s19, [#allocation4 + $0x9] }
  0xa7   :  { %s1324_s24 = smov [#allocation2 + $0x5]   ;;  %s1325_s6 = smov [#allocation3 + $0x5]  }
  0xa8   :  { %s250_s0 = sshll.u32 %s1324_s24, 4  ;;  %s265_s1 = sshll.u32 %s1325_s6, 4  ;;  %s251_s0 = int_to_ptr.vmem [resolvable:$true] %s250_s0  ;;  %s266_s1 = int_to_ptr.vmem [resolvable:$true] %s265_s1 }
  0xa9   :  { %1129 = shalt.err (!%p1430_p1)  }
  0xaa   :  { %s1130_s17 = scalar_lea.vmem %s251_s0, 16  ;;  %p1135_p12 = scmp.lt.s32.totalorder %s251_s0, %s1364_s26 }
  0xab   :  { %p1131_p10 = scmp.ne.s32.totalorder %s251_s0, %s1130_s17  ;;  %p1136_p13 = scmp.lt.s32.totalorder %s1394_s21, %s1130_s17 }
  0xad   :  { %p1137_p0 = por %p1136_p13, %p1135_p12 }
  0xaf   :  { %p1138_p2 = pnand %p1137_p0, %p1131_p10 }
  0xb1   :  { %1141 = shalt.err (!%p1138_p2)  }
  0xb2   :  { %253 = dma.hbm_to_vmem [thread:$0]  %s1421_s12, 16, %s251_s0, [#allocation4 + $0xa] }
  0xb3   :  { %1151 = shalt.err (!%p1456_p11)  }
  0xb4   :  { %s1152_s27 = scalar_lea.vmem %s266_s1, 16  ;;  %p1157_p4 = scmp.lt.s32.totalorder %s266_s1, %s1370_s29 }
  0xb5   :  { %p1153_p3 = scmp.ne.s32.totalorder %s266_s1, %s1152_s27  ;;  %p1158_p5 = scmp.lt.s32.totalorder %s1411_s2, %s1152_s27 }
  0xb7   :  { %p1159_p6 = por %p1158_p5, %p1157_p4 }
  0xb9   :  { %p1160_p7 = pnand %p1159_p6, %p1153_p3 }
  0xbb   :  { %1163 = shalt.err (!%p1160_p7)  }
  0xbc   :  { %268 = dma.hbm_to_vmem [thread:$0]  %s1446_s22, 16, %s266_s1, [#allocation4 + $0xb] }
  0xbd   :  { %s1326_s28 = smov [#allocation2 + $0x6]   ;;  %s1327_s9 = smov [#allocation3 + $0x6]  }
  0xbe   :  { %s290_s5 = sshll.u32 %s1326_s28, 4  ;;  %s305_s30 = sshll.u32 %s1327_s9, 4  ;;  %s291_s5 = int_to_ptr.vmem [resolvable:$true] %s290_s5  ;;  %s306_s30 = int_to_ptr.vmem [resolvable:$true] %s305_s30 }
  0xbf   :  { %1173 = shalt.err (!%p1430_p1)  }
  0xc0   :  { %s1174_s8 = scalar_lea.vmem %s291_s5, 16  ;;  %p1179_p9 = scmp.lt.s32.totalorder %s291_s5, %s1364_s26 }
  0xc1   :  { %p1175_p8 = scmp.ne.s32.totalorder %s291_s5, %s1174_s8  ;;  %p1180_p10 = scmp.lt.s32.totalorder %s1394_s21, %s1174_s8 }
  0xc3   :  { %p1181_p12 = por %p1180_p10, %p1179_p9 }
  0xc5   :  { %p1182_p13 = pnand %p1181_p12, %p1175_p8 }
  0xc7   :  { %1185 = shalt.err (!%p1182_p13)  }
  0xc8   :  { %293 = dma.hbm_to_vmem [thread:$0]  %s1421_s12, 16, %s291_s5, [#allocation4 + $0xc] }
  0xc9   :  { %1195 = shalt.err (!%p1456_p11)  }
  0xca   :  { %s1196_s10 = scalar_lea.vmem %s306_s30, 16  ;;  %p1201_p2 = scmp.lt.s32.totalorder %s306_s30, %s1370_s29 }
  0xcb   :  { %p1197_p0 = scmp.ne.s32.totalorder %s306_s30, %s1196_s10  ;;  %p1202_p3 = scmp.lt.s32.totalorder %s1411_s2, %s1196_s10 }
  0xcd   :  { %p1203_p4 = por %p1202_p3, %p1201_p2 }
  0xcf   :  { %p1204_p5 = pnand %p1203_p4, %p1197_p0 }
  0xd1   :  { %1207 = shalt.err (!%p1204_p5)  }
  0xd2   :  { %308 = dma.hbm_to_vmem [thread:$0]  %s1446_s22, 16, %s306_s30, [#allocation4 + $0xd] }
  0xd3   :  { %s1328_s11 = smov [#allocation2 + $0x7]   ;;  %s1329_s14 = smov [#allocation3 + $0x7]  }
  0xd4   :  { %s330_s13 = sshll.u32 %s1328_s11, 4  ;;  %s345_s15 = sshll.u32 %s1329_s14, 4  ;;  %s331_s13 = int_to_ptr.vmem [resolvable:$true] %s330_s13  ;;  %s346_s15 = int_to_ptr.vmem [resolvable:$true] %s345_s15 }
  0xd5   :  { %1217 = shalt.err (!%p1430_p1)  }
  0xd6   :  { %s1218_s16 = scalar_lea.vmem %s331_s13, 16  ;;  %p1223_p7 = scmp.lt.s32.totalorder %s331_s13, %s1364_s26 }
  0xd7   :  { %p1219_p6 = scmp.ne.s32.totalorder %s331_s13, %s1218_s16  ;;  %p1224_p8 = scmp.lt.s32.totalorder %s1394_s21, %s1218_s16 }
  0xd9   :  { %p1225_p9 = por %p1224_p8, %p1223_p7 }
  0xdb   :  { %p1226_p10 = pnand %p1225_p9, %p1219_p6 }
  0xdd   :  { %1229 = shalt.err (!%p1226_p10)  }
  0xde   :  { %333 = dma.hbm_to_vmem [thread:$0]  %s1421_s12, 16, %s331_s13, [#allocation4 + $0xe] }
  0xdf   :  { %1239 = shalt.err (!%p1456_p11)  }
  0xe0   :  { %s1240_s7 = scalar_lea.vmem %s346_s15, 16  ;;  %p1245_p13 = scmp.lt.s32.totalorder %s346_s15, %s1370_s29 }
  0xe1   :  { %p1241_p12 = scmp.ne.s32.totalorder %s346_s15, %s1240_s7  ;;  %p1246_p1 = scmp.lt.s32.totalorder %s1411_s2, %s1240_s7 }
  0xe3   :  { %p1247_p0 = por %p1246_p1, %p1245_p13 }
  0xe5   :  { %p1248_p2 = pnand %p1247_p0, %p1241_p12 }
  0xe7   :  { %1251 = shalt.err (!%p1248_p2)  }
  0xe8   :  { %348 = dma.hbm_to_vmem [thread:$0]  %s1446_s22, 16, %s346_s15, [#allocation4 + $0xf] }
  0xe9   :  { %1276 = dma.done.wait [#allocation4], 16 }
  0xea   :  { %1277 = vsyncadd [#allocation4], 4294967280 }
  0xeb   :  { %1278 = dma.done.wait [#allocation4 + $0x2], 16 }
  0xec   :  { %1279 = vsyncadd [#allocation4 + $0x2], 4294967280 }
  0xed   :  { %1280 = dma.done.wait [#allocation4 + $0x4], 16 }
  0xee   :  { %1281 = vsyncadd [#allocation4 + $0x4], 4294967280 }
  0xef   :  { %1282 = dma.done.wait [#allocation4 + $0x6], 16 }
  0xf0   :  { %1283 = vsyncadd [#allocation4 + $0x6], 4294967280 }
  0xf1   :  { %1284 = dma.done.wait [#allocation4 + $0x8], 16 }
  0xf2   :  { %1285 = vsyncadd [#allocation4 + $0x8], 4294967280 }
  0xf3   :  { %1286 = dma.done.wait [#allocation4 + $0xa], 16 }
  0xf4   :  { %1287 = vsyncadd [#allocation4 + $0xa], 4294967280 }
  0xf5   :  { %1288 = dma.done.wait [#allocation4 + $0xc], 16 }
  0xf6   :  { %1289 = vsyncadd [#allocation4 + $0xc], 4294967280 }
  0xf7   :  { %1290 = dma.done.wait [#allocation4 + $0xe], 16 }
  0xf8   :  { %1291 = vsyncadd [#allocation4 + $0xe], 4294967280  ;;  %v1330_v0 = vmov 0.0   ;;  %vm1331_vm0 = vmmov 0   ;;  %v370_v1 = vld [vmem:[#allocation7 + $0x18] sm:$0xff]  ;;  %v369_v2 = vld [vmem:[#allocation7 + $0x10] sm:$0xff] }
  0xf9   :  { %827 = vmatprep.subr.mxu0 %v1330_v0  ;;  %835 = vmatprep.mubr.msk.f32.mxu0 %vm1331_vm0, %v1330_v0  ;;  %v368_v3 = vld [vmem:[#allocation7 + $0x8] sm:$0xff]  ;;  %v367_v4 = vld [vmem:[#allocation7] sm:$0xff]  ;;  %v366_v5 = vld [vmem:[#allocation2] sm:$0xff]  ;;  %vm378_vm1 = vcmask 261120  }
  0xfa   :  { %828 = vmatpush3.msra.mxu0 %v370_v1  ;;  %v770_v6 = vld [vmem:[%s1538_s3] ss:$0 sm:$0xff] }
  0xfb   :  { %829 = vmatprep.subr.mxu0 %v1330_v0 }
  0xfc   :  { %830 = vmatpush3.msra.mxu0 %v369_v2 }
  0xfd   :  { %831 = vmatprep.subr.mxu0 %v1330_v0 }
  0xfe   :  { %832 = vmatpush3.msra.mxu0 %v368_v3 }
  0xff   :  { %833 = vmatprep.subr.mxu0 %v1330_v0 }
 0x100   :  { %834 = vmatpush3.msra.mxu0 %v367_v4 }
 0x101   :  { %836 = vmatmul.mubr.msk.f32.vlgmr.msra.gmra.mxu0 %vm378_vm1, %v366_v5 }
 0x1c1   :  { %v448_v7 = vpop.f32.mrf.mxu0 }
 0x1c2   :  { %v449_v8 = vadd.f32 %v770_v6, %v448_v7 }
 0x1c3   :  { %v837_v9 = vpop.f32.mrf.mxu0 }
 0x1c4   :  { %1292 = dma.done.wait [#allocation4 + $0x1], 16 }
 0x1c5   :  { %1293 = vsyncadd [#allocation4 + $0x1], 4294967280 }
 0x1c6   :  { %1294 = dma.done.wait [#allocation4 + $0x3], 16 }
 0x1c7   :  { %1295 = vsyncadd [#allocation4 + $0x3], 4294967280 }
 0x1c8   :  { %1296 = dma.done.wait [#allocation4 + $0x5], 16 }
 0x1c9   :  { %1297 = vsyncadd [#allocation4 + $0x5], 4294967280 }
 0x1ca   :  { %1298 = dma.done.wait [#allocation4 + $0x7], 16 }
 0x1cb   :  { %1299 = vsyncadd [#allocation4 + $0x7], 4294967280 }
 0x1cc   :  { %1300 = dma.done.wait [#allocation4 + $0x9], 16 }
 0x1cd   :  { %1301 = vsyncadd [#allocation4 + $0x9], 4294967280 }
 0x1ce   :  { %1302 = dma.done.wait [#allocation4 + $0xb], 16 }
 0x1cf   :  { %1303 = vsyncadd [#allocation4 + $0xb], 4294967280 }
 0x1d0   :  { %1304 = dma.done.wait [#allocation4 + $0xd], 16 }
 0x1d1   :  { %1305 = vsyncadd [#allocation4 + $0xd], 4294967280 }
 0x1d2   :  { %1306 = dma.done.wait [#allocation4 + $0xf], 16 }
 0x1d3   :  { %1307 = vsyncadd [#allocation4 + $0xf], 4294967280  ;;  %838 = vmatprep.subr.mxu1 %v1330_v0  ;;  %846 = vmatprep.mubr.msk.f32.mxu1 %vm1331_vm0, %v1330_v0  ;;  %v473_v10 = vld [vmem:[#allocation7 + $0x38] sm:$0xff]  ;;  %v472_v11 = vld [vmem:[#allocation7 + $0x30] sm:$0xff]  ;;  %s1332_s3 = smov [#allocation10]  }
 0x1d4   :  { %839 = vmatpush3.msra.mxu1 %v473_v10  ;;  %v471_v12 = vld [vmem:[#allocation7 + $0x28] sm:$0xff]  ;;  %v470_v13 = vld [vmem:[#allocation7 + $0x20] sm:$0xff]  ;;  %v468_v14 = vld [vmem:[#allocation3] sm:$0xff]  ;;  %s555_s21 = sshll.u32 %s1332_s3, 4  ;;  %s556_s21 = int_to_ptr.vmem [resolvable:$true] %s555_s21 }
 0x1d5   :  { %840 = vmatprep.subr.mxu1 %v1330_v0  ;;  %s1252_s2 = scalar_lea.vmem %s556_s21, 128  ;;  %p1257_p3 = scmp.lt.s32.totalorder %s556_s21, %s556_s21 }
 0x1d6   :  { %841 = vmatpush3.msra.mxu1 %v472_v11  ;;  %p1253_p11 = scmp.ne.s32.totalorder %s556_s21, %s1252_s2  ;;  %p1258_p4 = scmp.lt.s32.totalorder %s1252_s2, %s1252_s2 }
 0x1d7   :  { %842 = vmatprep.subr.mxu1 %v1330_v0 }
 0x1d8   :  { %843 = vmatpush3.msra.mxu1 %v471_v12  ;;  %p1259_p5 = por %p1258_p4, %p1257_p3 }
 0x1d9   :  { %844 = vmatprep.subr.mxu1 %v1330_v0 }
 0x1da   :  { %845 = vmatpush3.msra.mxu1 %v470_v13  ;;  %p1260_p6 = pnand %p1259_p5, %p1253_p11 }
 0x1db   :  { %847 = vmatmul.mubr.msk.f32.vlgmr.msra.gmra.mxu1 %vm378_vm1, %v468_v14 }
 0x29b   :  { %v543_v15 = vpop.f32.mrf.mxu1 }
 0x29c   :  { %v547_v16 = vadd.f32 %v543_v15, %v449_v8 }
 0x29d   :  { %v848_v17 = vpop.f32.mrf.mxu1 }
 0x29e   :  { %548 = vst [vmem:[#allocation10] sm:$0xff] %v547_v16 }
 0x29f   :  { %1263 = shalt.err (!%p1260_p6)
}
 0x2a0   :  { %558 = dma.vmem_to_hbm [thread:$0]  %s556_s21, 128, %s1539_s4, [#allocation9]  }
 0x2a1   :  { %1308 = dma.done.wait [#allocation9], 128  }
 0x2a2   :  { %1309 = vsyncadd [#allocation9], 4294967168 }
 0x2a3   :  { %562 = vsyncpa [#allocation8], 1 }
 0x2a4   :  { %563 = vsyncpa [#allocation9], 1 }
 0x2a5   :  { %564 = vsyncmov [#allocation4] }
 0x2a8   :  { %s565_s22 = vpop.sfrf %564 }
 0x2a9   :  { %p773_p7 = scmp.ne.s32.totalorder %s565_s22, 0 }
 0x2ab   :  { %569 = shalt.err (%p773_p7)  }
 0x2ac   :  { %571 = vsyncmov [#allocation4 + $0x1] }
 0x2af   :  { %s572_s25 = vpop.sfrf %571 }
 0x2b0   :  { %p774_p8 = scmp.ne.s32.totalorder %s572_s25, 0 }
 0x2b2   :  { %576 = shalt.err (%p774_p8)  }
 0x2b3   :  { %578 = vsyncmov [#allocation4 + $0x2] }
 0x2b6   :  { %s579_s19 = vpop.sfrf %578 }
 0x2b7   :  { %p775_p9 = scmp.ne.s32.totalorder %s579_s19, 0 }
 0x2b9   :  { %583 = shalt.err (%p775_p9)  }
 0x2ba   :  { %585 = vsyncmov [#allocation4 + $0x3] }
 0x2bd   :  { %s586_s20 = vpop.sfrf %585 }
 0x2be   :  { %p776_p10 = scmp.ne.s32.totalorder %s586_s20, 0 }
 0x2c0   :  { %590 = shalt.err (%p776_p10)  }
 0x2c1   :  { %592 = vsyncmov [#allocation4 + $0x4] }
 0x2c4   :  { %s593_s4 = vpop.sfrf %592 }
 0x2c5   :  { %p777_p12 = scmp.ne.s32.totalorder %s593_s4, 0 }
 0x2c7   :  { %597 = shalt.err (%p777_p12)  }
 0x2c8   :  { %599 = vsyncmov [#allocation4 + $0x5] }
 0x2cb   :  { %s600_s23 = vpop.sfrf %599 }
 0x2cc   :  { %p778_p13 = scmp.ne.s32.totalorder %s600_s23, 0 }
 0x2ce   :  { %604 = shalt.err (%p778_p13)  }
 0x2cf   :  { %606 = vsyncmov [#allocation4 + $0x6] }
 0x2d2   :  { %s607_s24 = vpop.sfrf %606 }
 0x2d3   :  { %p779_p1 = scmp.ne.s32.totalorder %s607_s24, 0 }
 0x2d5   :  { %611 = shalt.err (%p779_p1)  }
 0x2d6   :  { %613 = vsyncmov [#allocation4 + $0x7] }
 0x2d9   :  { %s614_s0 = vpop.sfrf %613 }
 0x2da   :  { %p780_p0 = scmp.ne.s32.totalorder %s614_s0, 0 }
 0x2dc   :  { %618 = shalt.err (%p780_p0)  }
 0x2dd   :  { %620 = vsyncmov [#allocation4 + $0x8] }
 0x2e0   :  { %s621_s6 = vpop.sfrf %620 }
 0x2e1   :  { %p781_p2 = scmp.ne.s32.totalorder %s621_s6, 0 }
 0x2e3   :  { %625 = shalt.err (%p781_p2)  }
 0x2e4   :  { %627 = vsyncmov [#allocation4 + $0x9] }
 0x2e7   :  { %s628_s1 = vpop.sfrf %627 }
 0x2e8   :  { %p782_p11 = scmp.ne.s32.totalorder %s628_s1, 0 }
 0x2ea   :  { %632 = shalt.err (%p782_p11)  }
 0x2eb   :  { %634 = vsyncmov [#allocation4 + $0xa] }
 0x2ee   :  { %s635_s17 = vpop.sfrf %634 }
 0x2ef   :  { %p783_p3 = scmp.ne.s32.totalorder %s635_s17, 0 }
 0x2f1   :  { %639 = shalt.err (%p783_p3)  }
 0x2f2   :  { %641 = vsyncmov [#allocation4 + $0xb] }
 0x2f5   :  { %s642_s27 = vpop.sfrf %641 }
 0x2f6   :  { %p784_p4 = scmp.ne.s32.totalorder %s642_s27, 0 }
 0x2f8   :  { %646 = shalt.err (%p784_p4)  }
 0x2f9   :  { %648 = vsyncmov [#allocation4 + $0xc] }
 0x2fc   :  { %s649_s28 = vpop.sfrf %648 }
 0x2fd   :  { %p785_p5 = scmp.ne.s32.totalorder %s649_s28, 0 }
 0x2ff   :  { %653 = shalt.err (%p785_p5)  }
 0x300   :  { %655 = vsyncmov [#allocation4 + $0xd] }
 0x303   :  { %s656_s5 = vpop.sfrf %655 }
 0x304   :  { %p786_p6 = scmp.ne.s32.totalorder %s656_s5, 0 }
 0x306   :  { %660 = shalt.err (%p786_p6)  }
 0x307   :  { %662 = vsyncmov [#allocation4 + $0xe] }
 0x30a   :  { %s663_s9 = vpop.sfrf %662 }
 0x30b   :  { %p787_p7 = scmp.ne.s32.totalorder %s663_s9, 0 }
 0x30d   :  { %667 = shalt.err (%p787_p7)  }
 0x30e   :  { %669 = vsyncmov [#allocation4 + $0xf] }
 0x311   :  { %s670_s30 = vpop.sfrf %669 }
 0x312   :  { %p788_p8 = scmp.ne.s32.totalorder %s670_s30, 0 }
 0x314   :  { %674 = shalt.err (%p788_p8)  }

</bundles_post_ra>
